<compile_context>
chip_gen: v6e
topology: v6e:2x2x1
jax: 0.10.0
libtpu: 0.0.40
codegen_flags: <defaults>
</compile_context>

<pallas_src>
import functools

import jax
import jax.numpy as jnp
from jax.experimental import pallas as pl
from jax.experimental.pallas import tpu as pltpu

LANE = 128


# --------------------------------- kernels -----------------------------------

def _mm_bias_act_kernel(x_ref, w_ref, b_ref, o_ref, *, slope):
    # x: (TM, K) bf16, w: (K, Cp) bf16, b: (1, Cp) f32 -> o: (TM, Cp)
    y = jnp.dot(x_ref[...], w_ref[...], preferred_element_type=jnp.float32)
    y = y + b_ref[...]
    if slope is not None:                       # fused LeakyReLU epilogue (f32)
        y = jnp.where(y >= 0.0, y, slope * y)
    o_ref[...] = y.astype(o_ref.dtype)


def _mm_instnorm_lrelu_kernel(x_ref, w_ref, g_ref, b_ref, o_ref, *, eps, slope):
    # One batch sample per grid step (InstanceNorm stats are per-sample).
    # x: (1, HW, K) bf16, w: (K, Cp) bf16, g/b: (1, Cp) f32 -> o: (1, HW, Cp)
    y = jnp.dot(x_ref[0], w_ref[...], preferred_element_type=jnp.float32)
    mean = jnp.mean(y, axis=0, keepdims=True)
    cen = y - mean
    var = jnp.mean(cen * cen, axis=0, keepdims=True)   # biased var (PyTorch IN)
    z = cen * jax.lax.rsqrt(var + eps) * g_ref[...] + b_ref[...]
    o_ref[0] = jnp.where(z >= 0.0, z, slope * z).astype(o_ref.dtype)


# ------------------------------ Pallas wrappers -------------------------------

def conv_bias_act(patches, w_mat, bias, *, slope, out_dtype, tm=512):
    """patches: (M, K).  w_mat: (K, Cp) lane-padded.  bias: (1, Cp)."""
    M, K = patches.shape
    Cp = w_mat.shape[1]
    TM = min(tm, M)
    n_blk = int(pl.cdiv(M, TM))
    Mp = n_blk * TM
    if Mp != M:
        patches = jnp.pad(patches, ((0, Mp - M), (0, 0)))
    out = pl.pallas_call(
        functools.partial(_mm_bias_act_kernel, slope=slope),
        out_shape=jax.ShapeDtypeStruct((Mp, Cp), out_dtype),
        grid=(n_blk,),
        in_specs=[pl.BlockSpec((TM, K), lambda i: (i, 0)),
                  pl.BlockSpec((K, Cp), lambda i: (0, 0)),
                  pl.BlockSpec((1, Cp), lambda i: (0, 0))],
        out_specs=pl.BlockSpec((TM, Cp), lambda i: (i, 0)),
        compiler_params=pltpu.CompilerParams(
            dimension_semantics=("parallel",)),
    )(patches.astype(jnp.bfloat16), w_mat.astype(jnp.bfloat16),
      bias.astype(jnp.float32))
    return out[:M]


def conv_instnorm_lrelu(patches, w_mat, gamma, beta, *, eps=1e-5, slope=0.2,
                        out_dtype=jnp.bfloat16):
    """patches: (N, HW, K) per-sample spatial slab.  w_mat: (K, Cp)."""
    N, HW, K = patches.shape
    Cp = w_mat.shape[1]
    return pl.pallas_call(
        functools.partial(_mm_instnorm_lrelu_kernel, eps=eps, slope=slope),
        out_shape=jax.ShapeDtypeStruct((N, HW, Cp), out_dtype),
        grid=(N,),
        in_specs=[pl.BlockSpec((1, HW, K), lambda n: (n, 0, 0)),
                  pl.BlockSpec((K, Cp), lambda n: (0, 0)),
                  pl.BlockSpec((1, Cp), lambda n: (0, 0)),
                  pl.BlockSpec((1, Cp), lambda n: (0, 0))],
        out_specs=pl.BlockSpec((1, HW, Cp), lambda n: (n, 0, 0)),
        compiler_params=pltpu.CompilerParams(
            dimension_semantics=("parallel",)),
    )(patches.astype(jnp.bfloat16), w_mat.astype(jnp.bfloat16),
      gamma.astype(jnp.float32), beta.astype(jnp.float32))


# ------------------------------ im2col (NHWC) ---------------------------------

def _im2col(x_nhwc, kH, kW, stride, padding):
    N, H, W, C = x_nhwc.shape
    if padding > 0:
        x_nhwc = jnp.pad(
            x_nhwc, ((0, 0), (padding, padding), (padding, padding), (0, 0)))
    Hp, Wp = H + 2 * padding, W + 2 * padding
    Hout = (Hp - kH) // stride + 1
    Wout = (Wp - kW) // stride + 1
    taps = [x_nhwc[:, ky:ky + stride * Hout:stride,
                   kx:kx + stride * Wout:stride, :]
            for ky in range(kH) for kx in range(kW)]
    patches = jnp.concatenate(taps, axis=-1)      # (N, Hout, Wout, kH*kW*C)
    return patches, Hout, Wout


# -------------------------------- parameters ----------------------------------

def _pad_lanes(a, cp):
    return jnp.pad(a, [(0, 0)] * (a.ndim - 1) + [(0, cp - a.shape[-1])])


def init_discriminator_params(key, channels_img, features_d):
    specs = [
        # (cin, cout, k, stride, pad, kind)   kind: 'lrelu' | 'in' | 'none'
        (channels_img,    features_d,     4, 2, 1, "lrelu"),
        (features_d,      features_d * 2, 4, 2, 1, "in"),
        (features_d * 2,  features_d * 4, 4, 2, 1, "in"),
        (features_d * 4,  features_d * 8, 4, 2, 1, "in"),
        (features_d * 8,  1,              4, 2, 0, "none"),
    ]
    params = []
    for (cin, cout, k, s, p, kind) in specs:
        key, kw, kb = jax.random.split(key, 3)
        w = 0.05 * jax.random.normal(kw, (cout, cin, k, k), jnp.float32)
        # PyTorch layout (Cout, Cin, kH, kW) -> (kH*kW*Cin, Cout), lane-pad Cout.
        w_mat = jnp.transpose(w, (2, 3, 1, 0)).reshape(k * k * cin, cout)
        cp = int(pl.cdiv(cout, LANE)) * LANE
        layer = {"w_mat": _pad_lanes(w_mat, cp), "cout": cout,
                 "k": k, "stride": s, "padding": p, "kind": kind}
        if kind == "in":
            layer["g_pad"] = _pad_lanes(jnp.ones((1, cout), jnp.float32), cp)
            layer["bt_pad"] = _pad_lanes(jnp.zeros((1, cout), jnp.float32), cp)
        else:
            b = 0.05 * jax.random.normal(kb, (cout,), jnp.float32)
            layer["b_pad"] = _pad_lanes(b.reshape(1, cout), cp)
        params.append(layer)
    return params


# --------------------------------- forward ------------------------------------

def discriminator_forward(params, x_nchw):
    x = jnp.transpose(x_nchw, (0, 2, 3, 1)).astype(jnp.float32)   # NHWC
    N = x.shape[0]
    for i, layer in enumerate(params):
        patches, Ho, Wo = _im2col(x, layer["k"], layer["k"],
                                  layer["stride"], layer["padding"])
        K = patches.shape[-1]
        cout = layer["cout"]
        last = i == len(params) - 1
        if layer["kind"] == "in":
            y = conv_instnorm_lrelu(patches.reshape(N, Ho * Wo, K),
                                    layer["w_mat"], layer["g_pad"],
                                    layer["bt_pad"])
            x = y[:, :, :cout].reshape(N, Ho, Wo, cout)
        else:
            slope = None if layer["kind"] == "none" else 0.2
            out_dtype = jnp.float32 if last else jnp.bfloat16
            y = conv_bias_act(patches.reshape(N * Ho * Wo, K),
                              layer["w_mat"], layer["b_pad"],
                              slope=slope, out_dtype=out_dtype)
            x = y[:, :cout].reshape(N, Ho, Wo, cout)
    return jnp.transpose(x, (0, 3, 1, 2))                          # NCHW


# ------------------------- pure-XLA f32 reference ------------------------------

def reference_forward(params, x_nchw):
    y = x_nchw.astype(jnp.float32)
    for layer in params:
        cout, k = layer["cout"], layer["k"]
        cin = y.shape[1]
        w_mat = layer["w_mat"][:, :cout]
        w = w_mat.reshape(k, k, cin, cout).transpose(3, 2, 0, 1)   # OIHW
        y = jax.lax.conv_general_dilated(
            y, w, window_strides=(layer["stride"],) * 2,
            padding=[(layer["padding"],) * 2] * 2,
            dimension_numbers=("NCHW", "OIHW", "NCHW"))
        if layer["kind"] == "in":
            mean = jnp.mean(y, axis=(2, 3), keepdims=True)
            var = jnp.mean((y - mean) ** 2, axis=(2, 3), keepdims=True)
            y = (y - mean) * jax.lax.rsqrt(var + 1e-5)
            g = layer["g_pad"][0, :cout].reshape(1, cout, 1, 1)
            b = layer["bt_pad"][0, :cout].reshape(1, cout, 1, 1)
            y = y * g + b
            y = jnp.where(y >= 0, y, 0.2 * y)
        else:
            y = y + layer["b_pad"][0, :cout].reshape(1, cout, 1, 1)
            if layer["kind"] == "lrelu":
                y = jnp.where(y >= 0, y, 0.2 * y)
    return y


# ----------------------------------- main --------------------------------------

if __name__ == "__main__":
    channels_img, features_d, batch = 3, 8, 2

    key = jax.random.PRNGKey(0)
    key, kx = jax.random.split(key)
    params = init_discriminator_params(key, channels_img, features_d)
    x = jax.random.normal(kx, (batch, channels_img, 64, 64), jnp.float32)

    fwd = jax.jit(lambda inp: discriminator_forward(params, inp))
    out = jax.block_until_ready(fwd(x))

    assert out.shape == (batch, 1, 1, 1), out.shape
    assert out.dtype == jnp.float32
    assert bool(jnp.all(jnp.isfinite(out)))

    # Loose sanity check vs f32 XLA reference (kernel uses bf16 MXU operands).
    ref = reference_forward(params, x)
    rel_err = float(jnp.max(jnp.abs(out - ref)) / (jnp.max(jnp.abs(ref)) + 1e-6))
    assert rel_err < 0.3, rel_err

    print("KERNEL_OK")
</pallas_src>

<mosaic_0001>
module attributes {stable_mosaic.version = 11 : i64} {
  func.func @_mm_bias_act_kernel(%arg0: i32, %arg1: memref<512x48xbf16, #tpu.memory_space<vmem>>, %arg2: memref<48x128xbf16, #tpu.memory_space<vmem>>, %arg3: memref<1x128xf32, #tpu.memory_space<vmem>>, %arg4: memref<512x128xbf16, #tpu.memory_space<vmem>>) attributes {dimension_semantics = [#tpu.dimension_semantics<parallel>], iteration_bounds = array<i64: 4>, scalar_prefetch = 0 : i64, scratch_operands = 0 : i64, tpu.core_type = #tpu.core_type<tc>, window_params = [{transform_indices = @transform_0, window_bounds = array<i64: 512, 48>}, {pipeline_mode = #tpu.pipeline_mode<synchronous>, transform_indices = @transform_1, window_bounds = array<i64: 48, 128>}, {pipeline_mode = #tpu.pipeline_mode<synchronous>, transform_indices = @transform_2, window_bounds = array<i64: 1, 128>}, {transform_indices = @transform_3, window_bounds = array<i64: 512, 128>}]} {
    %c0 = arith.constant 0 : index
    %c0_0 = arith.constant 0 : index
    %0 = vector.load %arg1[%c0, %c0_0] : memref<512x48xbf16, #tpu.memory_space<vmem>>, vector<512x48xbf16>
    %c0_1 = arith.constant 0 : index
    %c0_2 = arith.constant 0 : index
    %1 = vector.load %arg2[%c0_1, %c0_2] : memref<48x128xbf16, #tpu.memory_space<vmem>>, vector<48x128xbf16>
    %cst = arith.constant dense<0.000000e+00> : vector<512x128xf32>
    %2 = tpu.matmul %0, %1, %cst {dimension_numbers = #tpu.dot_dimension_numbers<[1], [0], [0], [1], [0, 0, 1, 1], [], []>} : vector<512x48xbf16>, vector<48x128xbf16>, vector<512x128xf32> -> vector<512x128xf32>
    %c0_3 = arith.constant 0 : index
    %c0_4 = arith.constant 0 : index
    %3 = vector.load %arg3[%c0_3, %c0_4] : memref<1x128xf32, #tpu.memory_space<vmem>>, vector<1x128xf32>
    %4 = vector.broadcast %3 : vector<1x128xf32> to vector<512x128xf32>
    %5 = arith.addf %2, %4 : vector<512x128xf32>
    %cst_5 = arith.constant 0.000000e+00 : f32
    %6 = vector.broadcast %cst_5 : f32 to vector<512x128xf32>
    %7 = arith.cmpf oge, %5, %6 : vector<512x128xf32>
    %cst_6 = arith.constant 2.000000e-01 : f32
    %8 = vector.broadcast %cst_6 : f32 to vector<512x128xf32>
    %9 = arith.mulf %8, %5 : vector<512x128xf32>
    %10 = arith.select %7, %5, %9 : vector<512x128xi1>, vector<512x128xf32>
    %11 = arith.truncf %10 : vector<512x128xf32> to vector<512x128xbf16>
    %c0_7 = arith.constant 0 : index
    %c0_8 = arith.constant 0 : index
    %12 = vector.load %arg4[%c0_7, %c0_8] : memref<512x128xbf16, #tpu.memory_space<vmem>>, vector<512x128xbf16>
    tpu.vector_store %arg4[%c0_7, %c0_8], %11 {strides = array<i32>} : memref<512x128xbf16, #tpu.memory_space<vmem>>, vector<512x128xbf16>,
    return
  }
  func.func @transform_0(%arg0: i32) -> (i32, i32) {
    %c0_i32 = arith.constant 0 : i32
    %c0_i32_0 = arith.constant 0 : i32
    return %arg0, %c0_i32 : i32, i32
  }
  func.func @transform_1(%arg0: i32) -> (i32, i32) {
    %c0_i32 = arith.constant 0 : i32
    %c0_i32_0 = arith.constant 0 : i32
    %c0_i32_1 = arith.constant 0 : i32
    return %c0_i32, %c0_i32_0 : i32, i32
  }
  func.func @transform_2(%arg0: i32) -> (i32, i32) {
    %c0_i32 = arith.constant 0 : i32
    %c0_i32_0 = arith.constant 0 : i32
    %c0_i32_1 = arith.constant 0 : i32
    return %c0_i32, %c0_i32_0 : i32, i32
  }
  func.func @transform_3(%arg0: i32) -> (i32, i32) {
    %c0_i32 = arith.constant 0 : i32
    %c0_i32_0 = arith.constant 0 : i32
    return %arg0, %c0_i32 : i32, i32
  }
}

module attributes {stable_mosaic.version = 11 : i64} {
  func.func @_mm_instnorm_lrelu_kernel(%arg0: i32, %arg1: memref<1x256x128xbf16, #tpu.memory_space<vmem>>, %arg2: memref<128x128xbf16, #tpu.memory_space<vmem>>, %arg3: memref<1x128xf32, #tpu.memory_space<vmem>>, %arg4: memref<1x128xf32, #tpu.memory_space<vmem>>, %arg5: memref<1x256x128xbf16, #tpu.memory_space<vmem>>) attributes {dimension_semantics = [#tpu.dimension_semantics<parallel>], iteration_bounds = array<i64: 2>, scalar_prefetch = 0 : i64, scratch_operands = 0 : i64, tpu.core_type = #tpu.core_type<tc>, window_params = [{transform_indices = @transform_0, window_bounds = array<i64: 1, 256, 128>}, {pipeline_mode = #tpu.pipeline_mode<synchronous>, transform_indices = @transform_1, window_bounds = array<i64: 128, 128>}, {pipeline_mode = #tpu.pipeline_mode<synchronous>, transform_indices = @transform_2, window_bounds = array<i64: 1, 128>}, {pipeline_mode = #tpu.pipeline_mode<synchronous>, transform_indices = @transform_3, window_bounds = array<i64: 1, 128>}, {transform_indices = @transform_4, window_bounds = array<i64: 1, 256, 128>}]} {
    %c0 = arith.constant 0 : index
    %c0_0 = arith.constant 0 : index
    %c0_1 = arith.constant 0 : index
    %0 = vector.load %arg1[%c0, %c0_0, %c0_1] : memref<1x256x128xbf16, #tpu.memory_space<vmem>>, vector<1x256x128xbf16>
    %1 = vector.shape_cast %0 : vector<1x256x128xbf16> to vector<256x128xbf16>
    %c0_2 = arith.constant 0 : index
    %c0_3 = arith.constant 0 : index
    %2 = vector.load %arg2[%c0_2, %c0_3] : memref<128x128xbf16, #tpu.memory_space<vmem>>, vector<128x128xbf16>
    %cst = arith.constant dense<0.000000e+00> : vector<256x128xf32>
    %3 = tpu.matmul %1, %2, %cst {dimension_numbers = #tpu.dot_dimension_numbers<[1], [0], [0], [1], [0, 0, 1, 1], [], []>} : vector<256x128xbf16>, vector<128x128xbf16>, vector<256x128xf32> -> vector<256x128xf32>
    %cst_4 = arith.constant dense<0.000000e+00> : vector<128xf32>
    %4 = vector.multi_reduction <add>, %3, %cst_4 [0] : vector<256x128xf32> to vector<128xf32>
    %5 = vector.shape_cast %4 : vector<128xf32> to vector<1x128xf32>
    %cst_5 = arith.constant 2.560000e+02 : f32
    %6 = vector.broadcast %cst_5 : f32 to vector<1x128xf32>
    %7 = arith.divf %5, %6 : vector<1x128xf32>
    %8 = vector.broadcast %7 : vector<1x128xf32> to vector<256x128xf32>
    %9 = arith.subf %3, %8 : vector<256x128xf32>
    %10 = arith.mulf %9, %9 : vector<256x128xf32>
    %cst_6 = arith.constant dense<0.000000e+00> : vector<128xf32>
    %11 = vector.multi_reduction <add>, %10, %cst_6 [0] : vector<256x128xf32> to vector<128xf32>
    %12 = vector.shape_cast %11 : vector<128xf32> to vector<1x128xf32>
    %cst_7 = arith.constant 2.560000e+02 : f32
    %13 = vector.broadcast %cst_7 : f32 to vector<1x128xf32>
    %14 = arith.divf %12, %13 : vector<1x128xf32>
    %cst_8 = arith.constant 9.99999974E-6 : f32
    %15 = vector.broadcast %cst_8 : f32 to vector<1x128xf32>
    %16 = arith.addf %14, %15 : vector<1x128xf32>
    %17 = math.rsqrt %16 : vector<1x128xf32>
    %18 = vector.broadcast %17 : vector<1x128xf32> to vector<256x128xf32>
    %19 = arith.mulf %9, %18 : vector<256x128xf32>
    %c0_9 = arith.constant 0 : index
    %c0_10 = arith.constant 0 : index
    %20 = vector.load %arg3[%c0_9, %c0_10] : memref<1x128xf32, #tpu.memory_space<vmem>>, vector<1x128xf32>
    %21 = vector.broadcast %20 : vector<1x128xf32> to vector<256x128xf32>
    %22 = arith.mulf %19, %21 : vector<256x128xf32>
    %c0_11 = arith.constant 0 : index
    %c0_12 = arith.constant 0 : index
    %23 = vector.load %arg4[%c0_11, %c0_12] : memref<1x128xf32, #tpu.memory_space<vmem>>, vector<1x128xf32>
    %24 = vector.broadcast %23 : vector<1x128xf32> to vector<256x128xf32>
    %25 = arith.addf %22, %24 : vector<256x128xf32>
    %cst_13 = arith.constant 0.000000e+00 : f32
    %26 = vector.broadcast %cst_13 : f32 to vector<256x128xf32>
    %27 = arith.cmpf oge, %25, %26 : vector<256x128xf32>
    %cst_14 = arith.constant 2.000000e-01 : f32
    %28 = vector.broadcast %cst_14 : f32 to vector<256x128xf32>
    %29 = arith.mulf %28, %25 : vector<256x128xf32>
    %30 = arith.select %27, %25, %29 : vector<256x128xi1>, vector<256x128xf32>
    %31 = arith.truncf %30 : vector<256x128xf32> to vector<256x128xbf16>
    %c0_15 = arith.constant 0 : index
    %c0_16 = arith.constant 0 : index
    %c0_17 = arith.constant 0 : index
    %32 = vector.load %arg5[%c0_15, %c0_16, %c0_17] : memref<1x256x128xbf16, #tpu.memory_space<vmem>>, vector<1x256x128xbf16>
    %33 = vector.shape_cast %32 : vector<1x256x128xbf16> to vector<256x128xbf16>
    %34 = vector.shape_cast %31 : vector<256x128xbf16> to vector<1x256x128xbf16>
    tpu.vector_store %arg5[%c0_15, %c0_16, %c0_17], %34 {strides = array<i32>} : memref<1x256x128xbf16, #tpu.memory_space<vmem>>, vector<1x256x128xbf16>,
    return
  }
  func.func @transform_0(%arg0: i32) -> (i32, i32, i32) {
    %c0_i32 = arith.constant 0 : i32
    %c0_i32_0 = arith.constant 0 : i32
    %c0_i32_1 = arith.constant 0 : i32
    return %arg0, %c0_i32, %c0_i32_0 : i32, i32, i32
  }
  func.func @transform_1(%arg0: i32) -> (i32, i32) {
    %c0_i32 = arith.constant 0 : i32
    %c0_i32_0 = arith.constant 0 : i32
    %c0_i32_1 = arith.constant 0 : i32
    return %c0_i32, %c0_i32_0 : i32, i32
  }
  func.func @transform_2(%arg0: i32) -> (i32, i32) {
    %c0_i32 = arith.constant 0 : i32
    %c0_i32_0 = arith.constant 0 : i32
    %c0_i32_1 = arith.constant 0 : i32
    return %c0_i32, %c0_i32_0 : i32, i32
  }
  func.func @transform_3(%arg0: i32) -> (i32, i32) {
    %c0_i32 = arith.constant 0 : i32
    %c0_i32_0 = arith.constant 0 : i32
    %c0_i32_1 = arith.constant 0 : i32
    return %c0_i32, %c0_i32_0 : i32, i32
  }
  func.func @transform_4(%arg0: i32) -> (i32, i32, i32) {
    %c0_i32 = arith.constant 0 : i32
    %c0_i32_0 = arith.constant 0 : i32
    %c0_i32_1 = arith.constant 0 : i32
    return %arg0, %c0_i32, %c0_i32_0 : i32, i32, i32
  }
}

module attributes {stable_mosaic.version = 11 : i64} {
  func.func @_mm_instnorm_lrelu_kernel(%arg0: i32, %arg1: memref<1x64x256xbf16, #tpu.memory_space<vmem>>, %arg2: memref<256x128xbf16, #tpu.memory_space<vmem>>, %arg3: memref<1x128xf32, #tpu.memory_space<vmem>>, %arg4: memref<1x128xf32, #tpu.memory_space<vmem>>, %arg5: memref<1x64x128xbf16, #tpu.memory_space<vmem>>) attributes {dimension_semantics = [#tpu.dimension_semantics<parallel>], iteration_bounds = array<i64: 2>, scalar_prefetch = 0 : i64, scratch_operands = 0 : i64, tpu.core_type = #tpu.core_type<tc>, window_params = [{transform_indices = @transform_0, window_bounds = array<i64: 1, 64, 256>}, {pipeline_mode = #tpu.pipeline_mode<synchronous>, transform_indices = @transform_1, window_bounds = array<i64: 256, 128>}, {pipeline_mode = #tpu.pipeline_mode<synchronous>, transform_indices = @transform_2, window_bounds = array<i64: 1, 128>}, {pipeline_mode = #tpu.pipeline_mode<synchronous>, transform_indices = @transform_3, window_bounds = array<i64: 1, 128>}, {transform_indices = @transform_4, window_bounds = array<i64: 1, 64, 128>}]} {
    %c0 = arith.constant 0 : index
    %c0_0 = arith.constant 0 : index
    %c0_1 = arith.constant 0 : index
    %0 = vector.load %arg1[%c0, %c0_0, %c0_1] : memref<1x64x256xbf16, #tpu.memory_space<vmem>>, vector<1x64x256xbf16>
    %1 = vector.shape_cast %0 : vector<1x64x256xbf16> to vector<64x256xbf16>
    %c0_2 = arith.constant 0 : index
    %c0_3 = arith.constant 0 : index
    %2 = vector.load %arg2[%c0_2, %c0_3] : memref<256x128xbf16, #tpu.memory_space<vmem>>, vector<256x128xbf16>
    %cst = arith.constant dense<0.000000e+00> : vector<64x128xf32>
    %3 = tpu.matmul %1, %2, %cst {dimension_numbers = #tpu.dot_dimension_numbers<[1], [0], [0], [1], [0, 0, 1, 1], [], []>} : vector<64x256xbf16>, vector<256x128xbf16>, vector<64x128xf32> -> vector<64x128xf32>
    %cst_4 = arith.constant dense<0.000000e+00> : vector<128xf32>
    %4 = vector.multi_reduction <add>, %3, %cst_4 [0] : vector<64x128xf32> to vector<128xf32>
    %5 = vector.shape_cast %4 : vector<128xf32> to vector<1x128xf32>
    %cst_5 = arith.constant 6.400000e+01 : f32
    %6 = vector.broadcast %cst_5 : f32 to vector<1x128xf32>
    %7 = arith.divf %5, %6 : vector<1x128xf32>
    %8 = vector.broadcast %7 : vector<1x128xf32> to vector<64x128xf32>
    %9 = arith.subf %3, %8 : vector<64x128xf32>
    %10 = arith.mulf %9, %9 : vector<64x128xf32>
    %cst_6 = arith.constant dense<0.000000e+00> : vector<128xf32>
    %11 = vector.multi_reduction <add>, %10, %cst_6 [0] : vector<64x128xf32> to vector<128xf32>
    %12 = vector.shape_cast %11 : vector<128xf32> to vector<1x128xf32>
    %cst_7 = arith.constant 6.400000e+01 : f32
    %13 = vector.broadcast %cst_7 : f32 to vector<1x128xf32>
    %14 = arith.divf %12, %13 : vector<1x128xf32>
    %cst_8 = arith.constant 9.99999974E-6 : f32
    %15 = vector.broadcast %cst_8 : f32 to vector<1x128xf32>
    %16 = arith.addf %14, %15 : vector<1x128xf32>
    %17 = math.rsqrt %16 : vector<1x128xf32>
    %18 = vector.broadcast %17 : vector<1x128xf32> to vector<64x128xf32>
    %19 = arith.mulf %9, %18 : vector<64x128xf32>
    %c0_9 = arith.constant 0 : index
    %c0_10 = arith.constant 0 : index
    %20 = vector.load %arg3[%c0_9, %c0_10] : memref<1x128xf32, #tpu.memory_space<vmem>>, vector<1x128xf32>
    %21 = vector.broadcast %20 : vector<1x128xf32> to vector<64x128xf32>
    %22 = arith.mulf %19, %21 : vector<64x128xf32>
    %c0_11 = arith.constant 0 : index
    %c0_12 = arith.constant 0 : index
    %23 = vector.load %arg4[%c0_11, %c0_12] : memref<1x128xf32, #tpu.memory_space<vmem>>, vector<1x128xf32>
    %24 = vector.broadcast %23 : vector<1x128xf32> to vector<64x128xf32>
    %25 = arith.addf %22, %24 : vector<64x128xf32>
    %cst_13 = arith.constant 0.000000e+00 : f32
    %26 = vector.broadcast %cst_13 : f32 to vector<64x128xf32>
    %27 = arith.cmpf oge, %25, %26 : vector<64x128xf32>
    %cst_14 = arith.constant 2.000000e-01 : f32
    %28 = vector.broadcast %cst_14 : f32 to vector<64x128xf32>
    %29 = arith.mulf %28, %25 : vector<64x128xf32>
    %30 = arith.select %27, %25, %29 : vector<64x128xi1>, vector<64x128xf32>
    %31 = arith.truncf %30 : vector<64x128xf32> to vector<64x128xbf16>
    %c0_15 = arith.constant 0 : index
    %c0_16 = arith.constant 0 : index
    %c0_17 = arith.constant 0 : index
    %32 = vector.load %arg5[%c0_15, %c0_16, %c0_17] : memref<1x64x128xbf16, #tpu.memory_space<vmem>>, vector<1x64x128xbf16>
    %33 = vector.shape_cast %32 : vector<1x64x128xbf16> to vector<64x128xbf16>
    %34 = vector.shape_cast %31 : vector<64x128xbf16> to vector<1x64x128xbf16>
    tpu.vector_store %arg5[%c0_15, %c0_16, %c0_17], %34 {strides = array<i32>} : memref<1x64x128xbf16, #tpu.memory_space<vmem>>, vector<1x64x128xbf16>,
    return
  }
  func.func @transform_0(%arg0: i32) -> (i32, i32, i32) {
    %c0_i32 = arith.constant 0 : i32
    %c0_i32_0 = arith.constant 0 : i32
    %c0_i32_1 = arith.constant 0 : i32
    return %arg0, %c0_i32, %c0_i32_0 : i32, i32, i32
  }
  func.func @transform_1(%arg0: i32) -> (i32, i32) {
    %c0_i32 = arith.constant 0 : i32
    %c0_i32_0 = arith.constant 0 : i32
    %c0_i32_1 = arith.constant 0 : i32
    return %c0_i32, %c0_i32_0 : i32, i32
  }
  func.func @transform_2(%arg0: i32) -> (i32, i32) {
    %c0_i32 = arith.constant 0 : i32
    %c0_i32_0 = arith.constant 0 : i32
    %c0_i32_1 = arith.constant 0 : i32
    return %c0_i32, %c0_i32_0 : i32, i32
  }
  func.func @transform_3(%arg0: i32) -> (i32, i32) {
    %c0_i32 = arith.constant 0 : i32
    %c0_i32_0 = arith.constant 0 : i32
    %c0_i32_1 = arith.constant 0 : i32
    return %c0_i32, %c0_i32_0 : i32, i32
  }
  func.func @transform_4(%arg0: i32) -> (i32, i32, i32) {
    %c0_i32 = arith.constant 0 : i32
    %c0_i32_0 = arith.constant 0 : i32
    %c0_i32_1 = arith.constant 0 : i32
    return %arg0, %c0_i32, %c0_i32_0 : i32, i32, i32
  }
}

module attributes {stable_mosaic.version = 11 : i64} {
  func.func @_mm_instnorm_lrelu_kernel(%arg0: i32, %arg1: memref<1x16x512xbf16, #tpu.memory_space<vmem>>, %arg2: memref<512x128xbf16, #tpu.memory_space<vmem>>, %arg3: memref<1x128xf32, #tpu.memory_space<vmem>>, %arg4: memref<1x128xf32, #tpu.memory_space<vmem>>, %arg5: memref<1x16x128xbf16, #tpu.memory_space<vmem>>) attributes {dimension_semantics = [#tpu.dimension_semantics<parallel>], iteration_bounds = array<i64: 2>, scalar_prefetch = 0 : i64, scratch_operands = 0 : i64, tpu.core_type = #tpu.core_type<tc>, window_params = [{transform_indices = @transform_0, window_bounds = array<i64: 1, 16, 512>}, {pipeline_mode = #tpu.pipeline_mode<synchronous>, transform_indices = @transform_1, window_bounds = array<i64: 512, 128>}, {pipeline_mode = #tpu.pipeline_mode<synchronous>, transform_indices = @transform_2, window_bounds = array<i64: 1, 128>}, {pipeline_mode = #tpu.pipeline_mode<synchronous>, transform_indices = @transform_3, window_bounds = array<i64: 1, 128>}, {transform_indices = @transform_4, window_bounds = array<i64: 1, 16, 128>}]} {
    %c0 = arith.constant 0 : index
    %c0_0 = arith.constant 0 : index
    %c0_1 = arith.constant 0 : index
    %0 = vector.load %arg1[%c0, %c0_0, %c0_1] : memref<1x16x512xbf16, #tpu.memory_space<vmem>>, vector<1x16x512xbf16>
    %1 = vector.shape_cast %0 : vector<1x16x512xbf16> to vector<16x512xbf16>
    %c0_2 = arith.constant 0 : index
    %c0_3 = arith.constant 0 : index
    %2 = vector.load %arg2[%c0_2, %c0_3] : memref<512x128xbf16, #tpu.memory_space<vmem>>, vector<512x128xbf16>
    %cst = arith.constant dense<0.000000e+00> : vector<16x128xf32>
    %3 = tpu.matmul %1, %2, %cst {dimension_numbers = #tpu.dot_dimension_numbers<[1], [0], [0], [1], [0, 0, 1, 1], [], []>} : vector<16x512xbf16>, vector<512x128xbf16>, vector<16x128xf32> -> vector<16x128xf32>
    %cst_4 = arith.constant dense<0.000000e+00> : vector<128xf32>
    %4 = vector.multi_reduction <add>, %3, %cst_4 [0] : vector<16x128xf32> to vector<128xf32>
    %5 = vector.shape_cast %4 : vector<128xf32> to vector<1x128xf32>
    %cst_5 = arith.constant 1.600000e+01 : f32
    %6 = vector.broadcast %cst_5 : f32 to vector<1x128xf32>
    %7 = arith.divf %5, %6 : vector<1x128xf32>
    %8 = vector.broadcast %7 : vector<1x128xf32> to vector<16x128xf32>
    %9 = arith.subf %3, %8 : vector<16x128xf32>
    %10 = arith.mulf %9, %9 : vector<16x128xf32>
    %cst_6 = arith.constant dense<0.000000e+00> : vector<128xf32>
    %11 = vector.multi_reduction <add>, %10, %cst_6 [0] : vector<16x128xf32> to vector<128xf32>
    %12 = vector.shape_cast %11 : vector<128xf32> to vector<1x128xf32>
    %cst_7 = arith.constant 1.600000e+01 : f32
    %13 = vector.broadcast %cst_7 : f32 to vector<1x128xf32>
    %14 = arith.divf %12, %13 : vector<1x128xf32>
    %cst_8 = arith.constant 9.99999974E-6 : f32
    %15 = vector.broadcast %cst_8 : f32 to vector<1x128xf32>
    %16 = arith.addf %14, %15 : vector<1x128xf32>
    %17 = math.rsqrt %16 : vector<1x128xf32>
    %18 = vector.broadcast %17 : vector<1x128xf32> to vector<16x128xf32>
    %19 = arith.mulf %9, %18 : vector<16x128xf32>
    %c0_9 = arith.constant 0 : index
    %c0_10 = arith.constant 0 : index
    %20 = vector.load %arg3[%c0_9, %c0_10] : memref<1x128xf32, #tpu.memory_space<vmem>>, vector<1x128xf32>
    %21 = vector.broadcast %20 : vector<1x128xf32> to vector<16x128xf32>
    %22 = arith.mulf %19, %21 : vector<16x128xf32>
    %c0_11 = arith.constant 0 : index
    %c0_12 = arith.constant 0 : index
    %23 = vector.load %arg4[%c0_11, %c0_12] : memref<1x128xf32, #tpu.memory_space<vmem>>, vector<1x128xf32>
    %24 = vector.broadcast %23 : vector<1x128xf32> to vector<16x128xf32>
    %25 = arith.addf %22, %24 : vector<16x128xf32>
    %cst_13 = arith.constant 0.000000e+00 : f32
    %26 = vector.broadcast %cst_13 : f32 to vector<16x128xf32>
    %27 = arith.cmpf oge, %25, %26 : vector<16x128xf32>
    %cst_14 = arith.constant 2.000000e-01 : f32
    %28 = vector.broadcast %cst_14 : f32 to vector<16x128xf32>
    %29 = arith.mulf %28, %25 : vector<16x128xf32>
    %30 = arith.select %27, %25, %29 : vector<16x128xi1>, vector<16x128xf32>
    %31 = arith.truncf %30 : vector<16x128xf32> to vector<16x128xbf16>
    %c0_15 = arith.constant 0 : index
    %c0_16 = arith.constant 0 : index
    %c0_17 = arith.constant 0 : index
    %32 = vector.load %arg5[%c0_15, %c0_16, %c0_17] : memref<1x16x128xbf16, #tpu.memory_space<vmem>>, vector<1x16x128xbf16>
    %33 = vector.shape_cast %32 : vector<1x16x128xbf16> to vector<16x128xbf16>
    %34 = vector.shape_cast %31 : vector<16x128xbf16> to vector<1x16x128xbf16>
    tpu.vector_store %arg5[%c0_15, %c0_16, %c0_17], %34 {strides = array<i32>} : memref<1x16x128xbf16, #tpu.memory_space<vmem>>, vector<1x16x128xbf16>,
    return
  }
  func.func @transform_0(%arg0: i32) -> (i32, i32, i32) {
    %c0_i32 = arith.constant 0 : i32
    %c0_i32_0 = arith.constant 0 : i32
    %c0_i32_1 = arith.constant 0 : i32
    return %arg0, %c0_i32, %c0_i32_0 : i32, i32, i32
  }
  func.func @transform_1(%arg0: i32) -> (i32, i32) {
    %c0_i32 = arith.constant 0 : i32
    %c0_i32_0 = arith.constant 0 : i32
    %c0_i32_1 = arith.constant 0 : i32
    return %c0_i32, %c0_i32_0 : i32, i32
  }
  func.func @transform_2(%arg0: i32) -> (i32, i32) {
    %c0_i32 = arith.constant 0 : i32
    %c0_i32_0 = arith.constant 0 : i32
    %c0_i32_1 = arith.constant 0 : i32
    return %c0_i32, %c0_i32_0 : i32, i32
  }
  func.func @transform_3(%arg0: i32) -> (i32, i32) {
    %c0_i32 = arith.constant 0 : i32
    %c0_i32_0 = arith.constant 0 : i32
    %c0_i32_1 = arith.constant 0 : i32
    return %c0_i32, %c0_i32_0 : i32, i32
  }
  func.func @transform_4(%arg0: i32) -> (i32, i32, i32) {
    %c0_i32 = arith.constant 0 : i32
    %c0_i32_0 = arith.constant 0 : i32
    %c0_i32_1 = arith.constant 0 : i32
    return %arg0, %c0_i32, %c0_i32_0 : i32, i32, i32
  }
}

module attributes {stable_mosaic.version = 11 : i64} {
  func.func @_mm_bias_act_kernel(%arg0: i32, %arg1: memref<2x1024xbf16, #tpu.memory_space<vmem>>, %arg2: memref<1024x128xbf16, #tpu.memory_space<vmem>>, %arg3: memref<1x128xf32, #tpu.memory_space<vmem>>, %arg4: memref<2x128xf32, #tpu.memory_space<vmem>>) attributes {dimension_semantics = [#tpu.dimension_semantics<parallel>], iteration_bounds = array<i64: 1>, scalar_prefetch = 0 : i64, scratch_operands = 0 : i64, tpu.core_type = #tpu.core_type<tc>, window_params = [{transform_indices = @transform_0, window_bounds = array<i64: 2, 1024>}, {pipeline_mode = #tpu.pipeline_mode<synchronous>, transform_indices = @transform_1, window_bounds = array<i64: 1024, 128>}, {pipeline_mode = #tpu.pipeline_mode<synchronous>, transform_indices = @transform_2, window_bounds = array<i64: 1, 128>}, {transform_indices = @transform_3, window_bounds = array<i64: 2, 128>}]} {
    %c0 = arith.constant 0 : index
    %c0_0 = arith.constant 0 : index
    %0 = vector.load %arg1[%c0, %c0_0] : memref<2x1024xbf16, #tpu.memory_space<vmem>>, vector<2x1024xbf16>
    %c0_1 = arith.constant 0 : index
    %c0_2 = arith.constant 0 : index
    %1 = vector.load %arg2[%c0_1, %c0_2] : memref<1024x128xbf16, #tpu.memory_space<vmem>>, vector<1024x128xbf16>
    %cst = arith.constant dense<0.000000e+00> : vector<2x128xf32>
    %2 = tpu.matmul %0, %1, %cst {dimension_numbers = #tpu.dot_dimension_numbers<[1], [0], [0], [1], [0, 0, 1, 1], [], []>} : vector<2x1024xbf16>, vector<1024x128xbf16>, vector<2x128xf32> -> vector<2x128xf32>
    %c0_3 = arith.constant 0 : index
    %c0_4 = arith.constant 0 : index
    %3 = vector.load %arg3[%c0_3, %c0_4] : memref<1x128xf32, #tpu.memory_space<vmem>>, vector<1x128xf32>
    %4 = vector.broadcast %3 : vector<1x128xf32> to vector<2x128xf32>
    %5 = arith.addf %2, %4 : vector<2x128xf32>
    %c0_5 = arith.constant 0 : index
    %c0_6 = arith.constant 0 : index
    %6 = vector.load %arg4[%c0_5, %c0_6] : memref<2x128xf32, #tpu.memory_space<vmem>>, vector<2x128xf32>
    tpu.vector_store %arg4[%c0_5, %c0_6], %5 {strides = array<i32>} : memref<2x128xf32, #tpu.memory_space<vmem>>, vector<2x128xf32>,
    return
  }
  func.func @transform_0(%arg0: i32) -> (i32, i32) {
    %c0_i32 = arith.constant 0 : i32
    %c0_i32_0 = arith.constant 0 : i32
    return %arg0, %c0_i32 : i32, i32
  }
  func.func @transform_1(%arg0: i32) -> (i32, i32) {
    %c0_i32 = arith.constant 0 : i32
    %c0_i32_0 = arith.constant 0 : i32
    %c0_i32_1 = arith.constant 0 : i32
    return %c0_i32, %c0_i32_0 : i32, i32
  }
  func.func @transform_2(%arg0: i32) -> (i32, i32) {
    %c0_i32 = arith.constant 0 : i32
    %c0_i32_0 = arith.constant 0 : i32
    %c0_i32_1 = arith.constant 0 : i32
    return %c0_i32, %c0_i32_0 : i32, i32
  }
  func.func @transform_3(%arg0: i32) -> (i32, i32) {
    %c0_i32 = arith.constant 0 : i32
    %c0_i32_0 = arith.constant 0 : i32
    return %arg0, %c0_i32 : i32, i32
  }
}

</mosaic_0001>

<bundles_post_ra>
// kernel: _lambda_.5
= control target key start
LH: loop header
LB: loop body
LE: loop exit
PB: predicated region body
PF: predicated region fallthrough
CT: control target
= control target key end

     0   :  { %s1964_s12 = smov 0   ;;  %s2169_s0 = inlined_call_operand.vmem [shape: bf16[2048,48], index: 0, kind: input, shape index: {}]   ;;  %s2170_s1 = inlined_call_operand.vmem [shape: bf16[48,128], index: 1, kind: input, shape index: {}]   ;;  %s2171_s2 = inlined_call_operand.vmem [shape: f32[1,128], index: 2, kind: input, shape index: {}]   ;;  %s2172_s3 = inlined_call_operand.vmem [shape: bf16[2048,128], index: 3, kind: output, shape index: {}]  }
   0x1 LB: > { %s1384_s13 = sadd.s32 4294967295, %s1942_s12   ;;  %p1388_p0 = scmp.ge.s32.totalorder %s1942_s12, 1  ;;  %s1942_s12 = sphi %s1964_s12, %s13_s12  }
   0x2   : > { %p138_p1 = scmp.lt.s32.totalorder %s1942_s12, 5 }
   0x4   : > { %p139_p2 = pnand %p1388_p0, %p138_p1 }
   0x5   : > { %s1389_s16 = sshll.u32 (!%p139_p2), %s1384_s13, 6 }
   0x6   : > { %142 = sbr.rel (%p139_p2) target bundleno = 294 (0x126), region = 32  ;;  %p163_p3 = scmp.lt.s32.totalorder (!%p139_p2), %s1389_s16, 255 }
   0xb   : > { %v1901_v0 = vld [vmem:[%s2170_s1 + $0x10] sm:$0xff]   ;;  %v1902_v1 = vld [vmem:[%s2170_s1 + $0x8] sm:$0xff]   ;;  %s2174_s16 = smov (!%p163_p3, %s1389_s16), 255  ;;  %v1903_v2 = vld [vmem:[%s2170_s1] sm:$0xff]   ;;  %vm430_vm0 = vcmask 392192  }
   0xc   : > { %1817 = vmatprep.subr.bf16.mxu0 %v1901_v0  ;;  %1887 = vmatprep.subr.bf16.mxu1 %v1901_v0  ;;  %s1390_s21 = sshll.u32 %s2174_s16, 2  ;;  %v2058_v35 = vld [vmem:[%s2171_s2] ss:$0 sm:$0xff] }
   0xd   : > { %1818 = vmatpush3.bf16.msra.mxu0 %v1901_v0  ;;  %1890 = vmatpush3.bf16.msra.mxu1 %v1901_v0  ;;  %s1989_s24 = scalar_lea.vmem %s2169_s0, %s1390_s21  ;;  %s2073_s29 = scalar_lea.vmem %s2172_s3, %s1390_s21 }
   0xe   : > { %1819 = vmatprep.subr.bf16.mxu0 %v1902_v1  ;;  %1888 = vmatprep.subr.bf16.mxu1 %v1902_v1  ;;  %v1904_v3 = vld [vmem:[%s1989_s24] sm:$0xff]   ;;  %v1906_v5 = vld [vmem:[%s1989_s24 + $0x8] sm:$0xff]   ;;  %v1908_v7 = vld [vmem:[%s1989_s24 + $0x10] sm:$0xff]  }
   0xf   : > { %v1905_v4 = vld [vmem:[%s1989_s24 + $0x80] sm:$0xff]   ;;  %1823 = vmatprep.mubr.msk.bf16.mxu0 %vm430_vm0, %v1904_v3  ;;  %v1907_v6 = vld [vmem:[%s1989_s24 + $0x88] sm:$0xff]   ;;  %v1909_v8 = vld [vmem:[%s1989_s24 + $0x90] sm:$0xff]  }
  0x10   : > { %1855 = vmatprep.mubr.msk.bf16.mxu1 %vm430_vm0, %v1905_v4  ;;  %v1910_v9 = vld [vmem:[%s1989_s24 + $0x18] sm:$0xff]   ;;  %v1912_v11 = vld [vmem:[%s1989_s24 + $0x20] sm:$0xff]   ;;  %v1914_v13 = vld [vmem:[%s1989_s24 + $0x28] sm:$0xff]  }
  0x11   : > { %1820 = vmatpush3.bf16.msra.mxu0 %v1902_v1  ;;  %1891 = vmatpush3.bf16.msra.mxu1 %v1902_v1  ;;  %v1911_v10 = vld [vmem:[%s1989_s24 + $0x98] sm:$0xff]   ;;  %v1913_v12 = vld [vmem:[%s1989_s24 + $0xa0] sm:$0xff]   ;;  %v1915_v14 = vld [vmem:[%s1989_s24 + $0xa8] sm:$0xff]  }
  0x12   : > { %1821 = vmatprep.subr.bf16.mxu0 %v1903_v2  ;;  %1889 = vmatprep.subr.bf16.mxu1 %v1903_v2  ;;  %v1916_v15 = vld [vmem:[%s1989_s24 + $0x30] sm:$0xff]   ;;  %v1918_v17 = vld [vmem:[%s1989_s24 + $0x38] sm:$0xff]   ;;  %v1920_v19 = vld [vmem:[%s1989_s24 + $0x40] sm:$0xff]  }
  0x13   : > { %v1917_v16 = vld [vmem:[%s1989_s24 + $0xb0] sm:$0xff]   ;;  %v1919_v18 = vld [vmem:[%s1989_s24 + $0xb8] sm:$0xff]   ;;  %v1921_v20 = vld [vmem:[%s1989_s24 + $0xc0] sm:$0xff]  }
  0x14   : > { %v1922_v21 = vld [vmem:[%s1989_s24 + $0x48] sm:$0xff]   ;;  %v1924_v23 = vld [vmem:[%s1989_s24 + $0x50] sm:$0xff]   ;;  %v1926_v25 = vld [vmem:[%s1989_s24 + $0x58] sm:$0xff]  }
  0x15   : > { %1822 = vmatpush3.bf16.msra.mxu0 %v1903_v2  ;;  %1892 = vmatpush3.bf16.msra.mxu1 %v1903_v2  ;;  %v1923_v22 = vld [vmem:[%s1989_s24 + $0xc8] sm:$0xff]   ;;  %v1925_v24 = vld [vmem:[%s1989_s24 + $0xd0] sm:$0xff]   ;;  %v1927_v26 = vld [vmem:[%s1989_s24 + $0xd8] sm:$0xff]  }
  0x16   : > { %v1928_v27 = vld [vmem:[%s1989_s24 + $0x60] sm:$0xff]   ;;  %v1930_v29 = vld [vmem:[%s1989_s24 + $0x68] sm:$0xff]   ;;  %v1932_v31 = vld [vmem:[%s1989_s24 + $0x70] sm:$0xff]  }
  0x17   : > { %v1929_v28 = vld [vmem:[%s1989_s24 + $0xe0] sm:$0xff]   ;;  %v1931_v30 = vld [vmem:[%s1989_s24 + $0xe8] sm:$0xff]   ;;  %v1933_v32 = vld [vmem:[%s1989_s24 + $0xf0] sm:$0xff]  }
  0x18   : > { %1824 = vmatmul.mubr.msk.bf16.vlgmr.msra.gmra.mxu0 %vm430_vm0, %v1906_v5  ;;  %1856 = vmatmul.mubr.msk.bf16.vlgmr.msra.gmra.mxu1 %vm430_vm0, %v1907_v6  ;;  %v1934_v33 = vld [vmem:[%s1989_s24 + $0x78] sm:$0xff]  }
  0x19   : > { %1827 = vmatprep.mubr.msk.bf16.mxu0 %vm430_vm0, %v1908_v7  ;;  %1859 = vmatprep.mubr.msk.bf16.mxu1 %vm430_vm0, %v1909_v8  ;;  %v1935_v34 = vld [vmem:[%s1989_s24 + $0xf8] sm:$0xff]  }
  0x20   : > { %1828 = vmatmul.mubr.msk.bf16.gmra.mxu0 %vm430_vm0, %v1910_v9  ;;  %1860 = vmatmul.mubr.msk.bf16.gmra.mxu1 %vm430_vm0, %v1911_v10 }
  0x21   : > { %1831 = vmatprep.mubr.msk.bf16.mxu0 %vm430_vm0, %v1912_v11  ;;  %1863 = vmatprep.mubr.msk.bf16.mxu1 %vm430_vm0, %v1913_v12 }
  0x28   : > { %1832 = vmatmul.mubr.msk.bf16.gmra.mxu0 %vm430_vm0, %v1914_v13  ;;  %1864 = vmatmul.mubr.msk.bf16.gmra.mxu1 %vm430_vm0, %v1915_v14 }
  0x29   : > { %1835 = vmatprep.mubr.msk.bf16.mxu0 %vm430_vm0, %v1916_v15  ;;  %1867 = vmatprep.mubr.msk.bf16.mxu1 %vm430_vm0, %v1917_v16 }
  0x30   : > { %1836 = vmatmul.mubr.msk.bf16.gmra.mxu0 %vm430_vm0, %v1918_v17  ;;  %1868 = vmatmul.mubr.msk.bf16.gmra.mxu1 %vm430_vm0, %v1919_v18 }
  0x31   : > { %1839 = vmatprep.mubr.msk.bf16.mxu0 %vm430_vm0, %v1920_v19  ;;  %1871 = vmatprep.mubr.msk.bf16.mxu1 %vm430_vm0, %v1921_v20 }
  0x38   : > { %1840 = vmatmul.mubr.msk.bf16.gmra.mxu0 %vm430_vm0, %v1922_v21  ;;  %1872 = vmatmul.mubr.msk.bf16.gmra.mxu1 %vm430_vm0, %v1923_v22 }
  0x39   : > { %1843 = vmatprep.mubr.msk.bf16.mxu0 %vm430_vm0, %v1924_v23  ;;  %1875 = vmatprep.mubr.msk.bf16.mxu1 %vm430_vm0, %v1925_v24 }
  0x40   : > { %1844 = vmatmul.mubr.msk.bf16.gmra.mxu0 %vm430_vm0, %v1926_v25  ;;  %1876 = vmatmul.mubr.msk.bf16.gmra.mxu1 %vm430_vm0, %v1927_v26 }
  0x41   : > { %1847 = vmatprep.mubr.msk.bf16.mxu0 %vm430_vm0, %v1928_v27  ;;  %1879 = vmatprep.mubr.msk.bf16.mxu1 %vm430_vm0, %v1929_v28 }
  0x48   : > { %1848 = vmatmul.mubr.msk.bf16.gmra.mxu0 %vm430_vm0, %v1930_v29  ;;  %1880 = vmatmul.mubr.msk.bf16.gmra.mxu1 %vm430_vm0, %v1931_v30 }
  0x49   : > { %1851 = vmatprep.mubr.msk.bf16.mxu0 %vm430_vm0, %v1932_v31  ;;  %1883 = vmatprep.mubr.msk.bf16.mxu1 %vm430_vm0, %v1933_v32 }
  0x50   : > { %1852 = vmatmul.mubr.msk.bf16.gmra.mxu0 %vm430_vm0, %v1934_v33  ;;  %1884 = vmatmul.mubr.msk.bf16.gmra.mxu1 %vm430_vm0, %v1935_v34 }
  0xd8   : > { %v1825_v36 = vpop.f32.mrf.mxu0  ;;  %v1857_v37 = vpop.f32.mrf.mxu1 }
  0xd9   : > { %v570_v38 = vadd.f32 %v1825_v36, %v2058_v35  ;;  %v698_v39 = vadd.f32 %v1857_v37, %v2058_v35 }
  0xda   : > { %v561_v40 = vpop.f32.mrf.mxu0  ;;  %v689_v41 = vpop.f32.mrf.mxu1 }
  0xdb   : > { %vm818_vm1 = vcmp.ge.f32.partialorder %v570_v38, 0.0  ;;  %v882_v42 = vmul.f32 0.2, %v570_v38  ;;  %vm850_vm2 = vcmp.ge.f32.partialorder %v698_v39, 0.0  ;;  %v914_v43 = vmul.f32 0.2, %v698_v39 }
  0xdc   : > { %v562_v44 = vadd.f32 %v2058_v35, %v561_v40  ;;  %v690_v45 = vadd.f32 %v2058_v35, %v689_v41  ;;  %v1826_v46 = vpop.f32.mrf.mxu0  ;;  %v1858_v47 = vpop.f32.mrf.mxu1 }
  0xdd   : > { %v946_v48 = vsel %vm818_vm1, %v570_v38, %v882_v42  ;;  %v573_v49 = vadd.f32 %v1826_v46, %v2058_v35  ;;  %v701_v50 = vadd.f32 %v1858_v47, %v2058_v35  ;;  %v978_v51 = vsel %vm850_vm2, %v698_v39, %v914_v43 }
  0xde   : > { %vm816_vm3 = vcmp.ge.f32.partialorder %v562_v44, 0.0  ;;  %v880_v52 = vmul.f32 0.2, %v562_v44  ;;  %vm848_vm4 = vcmp.ge.f32.partialorder %v690_v45, 0.0  ;;  %v564_v53 = vpop.f32.mrf.mxu0  ;;  %v692_v54 = vpop.f32.mrf.mxu1  ;;  %v912_v58 = vmul.f32 0.2, %v690_v45 }
  0xdf   : > { %vm819_vm5 = vcmp.ge.f32.partialorder %v573_v49, 0.0  ;;  %v883_v55 = vmul.f32 0.2, %v573_v49  ;;  %vm851_vm6 = vcmp.ge.f32.partialorder %v701_v50, 0.0  ;;  %v915_v56 = vmul.f32 0.2, %v701_v50 }
  0xe0   : > { %v944_v57 = vsel %vm816_vm3, %v562_v44, %v880_v52  ;;  %v565_v59 = vadd.f32 %v2058_v35, %v564_v53  ;;  %v693_v60 = vadd.f32 %v2058_v35, %v692_v54  ;;  %v1829_v61 = vpop.f32.mrf.mxu0  ;;  %v1861_v62 = vpop.f32.mrf.mxu1  ;;  %v976_v10 = vsel %vm848_vm4, %v690_v45, %v912_v58 }
  0xe1   : > { %v947_v63 = vsel %vm819_vm5, %v573_v49, %v883_v55  ;;  %v979_v0 = vsel %vm851_vm6, %v701_v50, %v915_v56  ;;  %v586_v1 = vadd.f32 %v1829_v61, %v2058_v35  ;;  %v714_v2 = vadd.f32 %v1861_v62, %v2058_v35 }
  0xe2   : > { %v1599_v3 = vpack.c.bf16 %v947_v63, %v946_v48  ;;  %v1679_v4 = vpack.c.bf16 %v979_v0, %v978_v51  ;;  %vm817_vm7 = vcmp.ge.f32.partialorder %v565_v59, 0.0  ;;  %v881_v5 = vmul.f32 0.2, %v565_v59  ;;  %v577_v6 = vpop.f32.mrf.mxu0  ;;  %v705_v7 = vpop.f32.mrf.mxu1 }
  0xe3   : > { %vm849_vm8 = vcmp.ge.f32.partialorder %v693_v60, 0.0  ;;  %v913_v8 = vmul.f32 0.2, %v693_v60  ;;  %vm822_vm9 = vcmp.ge.f32.partialorder %v586_v1, 0.0  ;;  %v886_v9 = vmul.f32 0.2, %v586_v1 }
  0xe4   : > { %1751 = vst [vmem:[%s2073_s29 + $0x8] sm:$0xff] %v1599_v3   ;;  %1767 = vst [vmem:[%s2073_s29 + $0x88] sm:$0xff] %v1679_v4   ;;  %v945_v11 = vsel %vm817_vm7, %v565_v59, %v881_v5  ;;  %v918_v12 = vmul.f32 0.2, %v714_v2  ;;  %v578_v13 = vadd.f32 %v2058_v35, %v577_v6  ;;  %v1830_v14 = vpop.f32.mrf.mxu0  ;;  %v1862_v15 = vpop.f32.mrf.mxu1  ;;  %vm854_vm10 = vcmp.ge.f32.partialorder %v714_v2, 0.0 }
  0xe5   : > { %v1594_v16 = vpack.c.bf16 %v945_v11, %v944_v57  ;;  %v977_v17 = vsel %vm849_vm8, %v693_v60, %v913_v8  ;;  %v706_v18 = vadd.f32 %v2058_v35, %v705_v7  ;;  %v950_v20 = vsel %vm822_vm9, %v586_v1, %v886_v9 }
  0xe6   : > { %v1674_v19 = vpack.c.bf16 %v977_v17, %v976_v10  ;;  %vm820_vm11 = vcmp.ge.f32.partialorder %v578_v13, 0.0  ;;  %v884_v21 = vmul.f32 0.2, %v578_v13  ;;  %v580_v22 = vpop.f32.mrf.mxu0  ;;  %v708_v23 = vpop.f32.mrf.mxu1  ;;  %v589_v25 = vadd.f32 %v1830_v14, %v2058_v35 }
  0xe7   : > { %1595 = vst [vmem:[%s2073_s29] sm:$0xff] %v1594_v16   ;;  %vm852_vm12 = vcmp.ge.f32.partialorder %v706_v18, 0.0  ;;  %v916_v24 = vmul.f32 0.2, %v706_v18  ;;  %v717_v26 = vadd.f32 %v1862_v15, %v2058_v35  ;;  %v982_v27 = vsel %vm854_vm10, %v714_v2, %v918_v12 }
  0xe8   : > { %1766 = vst [vmem:[%s2073_s29 + $0x80] sm:$0xff] %v1674_v19   ;;  %v948_v28 = vsel %vm820_vm11, %v578_v13, %v884_v21  ;;  %v581_v29 = vadd.f32 %v2058_v35, %v580_v22  ;;  %v709_v30 = vadd.f32 %v2058_v35, %v708_v23  ;;  %v1833_v31 = vpop.f32.mrf.mxu0  ;;  %v1865_v32 = vpop.f32.mrf.mxu1  ;;  %vm823_vm13 = vcmp.ge.f32.partialorder %v589_v25, 0.0 }
  0xe9   : > { %v980_v33 = vsel %vm852_vm12, %v706_v18, %v916_v24  ;;  %v887_v34 = vmul.f32 0.2, %v589_v25  ;;  %vm855_vm14 = vcmp.ge.f32.partialorder %v717_v26, 0.0  ;;  %v919_v36 = vmul.f32 0.2, %v717_v26 }
  0xea   : > { %vm821_vm15 = vcmp.ge.f32.partialorder %v581_v29, 0.0  ;;  %v885_v37 = vmul.f32 0.2, %v581_v29  ;;  %vm853_vm0 = vcmp.ge.f32.partialorder %v709_v30, 0.0  ;;  %v593_v38 = vpop.f32.mrf.mxu0  ;;  %v721_v39 = vpop.f32.mrf.mxu1  ;;  %v917_v41 = vmul.f32 0.2, %v709_v30 }
  0xeb   : > { %v951_v40 = vsel %vm823_vm13, %v589_v25, %v887_v34  ;;  %v602_v42 = vadd.f32 %v1833_v31, %v2058_v35  ;;  %v730_v43 = vadd.f32 %v1865_v32, %v2058_v35  ;;  %v983_v45 = vsel %vm855_vm14, %v717_v26, %v919_v36 }
  0xec   : > { %v1609_v44 = vpack.c.bf16 %v951_v40, %v950_v20  ;;  %v949_v46 = vsel %vm821_vm15, %v581_v29, %v885_v37  ;;  %v594_v47 = vadd.f32 %v2058_v35, %v593_v38  ;;  %v1834_v48 = vpop.f32.mrf.mxu0  ;;  %v1866_v49 = vpop.f32.mrf.mxu1  ;;  %v1689_v50 = vpack.c.bf16 %v983_v45, %v982_v27 }
  0xed   : > { %v1604_v51 = vpack.c.bf16 %v949_v46, %v948_v28  ;;  %v981_v52 = vsel %vm853_vm0, %v709_v30, %v917_v41  ;;  %vm826_vm1 = vcmp.ge.f32.partialorder %v602_v42, 0.0  ;;  %v890_v54 = vmul.f32 0.2, %v602_v42 }
  0xee   : > { %1753 = vst [vmem:[%s2073_s29 + $0x18] sm:$0xff] %v1609_v44   ;;  %v1684_v53 = vpack.c.bf16 %v981_v52, %v980_v33  ;;  %vm858_vm2 = vcmp.ge.f32.partialorder %v730_v43, 0.0  ;;  %v922_v55 = vmul.f32 0.2, %v730_v43  ;;  %v596_v56 = vpop.f32.mrf.mxu0  ;;  %v724_v57 = vpop.f32.mrf.mxu1  ;;  %1769 = vst [vmem:[%s2073_s29 + $0x98] sm:$0xff] %v1689_v50   ;;  %vm824_vm3 = vcmp.ge.f32.partialorder %v594_v47, 0.0 }
  0xef   : > { %1752 = vst [vmem:[%s2073_s29 + $0x10] sm:$0xff] %v1604_v51   ;;  %v888_v58 = vmul.f32 0.2, %v594_v47  ;;  %v722_v59 = vadd.f32 %v2058_v35, %v721_v39  ;;  %v605_v60 = vadd.f32 %v1834_v48, %v2058_v35  ;;  %v954_v61 = vsel %vm826_vm1, %v602_v42, %v890_v54 }
  0xf0   : > { %1768 = vst [vmem:[%s2073_s29 + $0x90] sm:$0xff] %v1684_v53   ;;  %v986_v62 = vsel %vm858_vm2, %v730_v43, %v922_v55  ;;  %v733_v63 = vadd.f32 %v1866_v49, %v2058_v35  ;;  %v597_v0 = vadd.f32 %v2058_v35, %v596_v56  ;;  %v1837_v1 = vpop.f32.mrf.mxu0  ;;  %v1869_v2 = vpop.f32.mrf.mxu1  ;;  %v725_v11 = vadd.f32 %v2058_v35, %v724_v57 }
  0xf1   : > { %v952_v3 = vsel %vm824_vm3, %v594_v47, %v888_v58  ;;  %vm856_vm4 = vcmp.ge.f32.partialorder %v722_v59, 0.0  ;;  %v920_v4 = vmul.f32 0.2, %v722_v59  ;;  %vm827_vm5 = vcmp.ge.f32.partialorder %v605_v60, 0.0 }
  0xf2   : > { %v891_v5 = vmul.f32 0.2, %v605_v60  ;;  %vm859_vm6 = vcmp.ge.f32.partialorder %v733_v63, 0.0  ;;  %v923_v6 = vmul.f32 0.2, %v733_v63  ;;  %vm825_vm7 = vcmp.ge.f32.partialorder %v597_v0, 0.0  ;;  %v609_v7 = vpop.f32.mrf.mxu0  ;;  %v737_v8 = vpop.f32.mrf.mxu1 }
  0xf3   : > { %v984_v9 = vsel %vm856_vm4, %v722_v59, %v920_v4  ;;  %v889_v10 = vmul.f32 0.2, %v597_v0  ;;  %v618_v12 = vadd.f32 %v1837_v1, %v2058_v35  ;;  %v746_v15 = vadd.f32 %v1869_v2, %v2058_v35 }
  0xf4   : > { %v955_v13 = vsel %vm827_vm5, %v605_v60, %v891_v5  ;;  %v987_v14 = vsel %vm859_vm6, %v733_v63, %v923_v6  ;;  %v610_v16 = vadd.f32 %v2058_v35, %v609_v7  ;;  %v1838_v17 = vpop.f32.mrf.mxu0  ;;  %v1870_v18 = vpop.f32.mrf.mxu1  ;;  %vm857_vm8 = vcmp.ge.f32.partialorder %v725_v11, 0.0 }
  0xf5   : > { %v1619_v19 = vpack.c.bf16 %v955_v13, %v954_v61  ;;  %v1699_v20 = vpack.c.bf16 %v987_v14, %v986_v62  ;;  %v953_v21 = vsel %vm825_vm7, %v597_v0, %v889_v10  ;;  %v921_v23 = vmul.f32 0.2, %v725_v11 }
  0xf6   : > { %v1614_v22 = vpack.c.bf16 %v953_v21, %v952_v3  ;;  %vm830_vm9 = vcmp.ge.f32.partialorder %v618_v12, 0.0  ;;  %v894_v24 = vmul.f32 0.2, %v618_v12  ;;  %v612_v25 = vpop.f32.mrf.mxu0  ;;  %v740_v26 = vpop.f32.mrf.mxu1  ;;  %vm862_vm10 = vcmp.ge.f32.partialorder %v746_v15, 0.0 }
  0xf7   : > { %1755 = vst [vmem:[%s2073_s29 + $0x28] sm:$0xff] %v1619_v19   ;;  %1771 = vst [vmem:[%s2073_s29 + $0xa8] sm:$0xff] %v1699_v20   ;;  %v926_v27 = vmul.f32 0.2, %v746_v15  ;;  %vm828_vm11 = vcmp.ge.f32.partialorder %v610_v16, 0.0  ;;  %v985_v29 = vsel %vm857_vm8, %v725_v11, %v921_v23  ;;  %v738_v31 = vadd.f32 %v2058_v35, %v737_v8 }
  0xf8   : > { %v892_v28 = vmul.f32 0.2, %v610_v16  ;;  %1754 = vst [vmem:[%s2073_s29 + $0x20] sm:$0xff] %v1614_v22   ;;  %v958_v30 = vsel %vm830_vm9, %v618_v12, %v894_v24  ;;  %v621_v32 = vadd.f32 %v1838_v17, %v2058_v35  ;;  %v1841_v33 = vpop.f32.mrf.mxu0  ;;  %v1873_v34 = vpop.f32.mrf.mxu1  ;;  %v1694_v36 = vpack.c.bf16 %v985_v29, %v984_v9 }
  0xf9   : > { %v990_v37 = vsel %vm862_vm10, %v746_v15, %v926_v27  ;;  %v749_v39 = vadd.f32 %v1870_v18, %v2058_v35  ;;  %vm860_vm12 = vcmp.ge.f32.partialorder %v738_v31, 0.0  ;;  %v924_v40 = vmul.f32 0.2, %v738_v31 }
  0xfa   : > { %v956_v38 = vsel %vm828_vm11, %v610_v16, %v892_v28  ;;  %vm831_vm13 = vcmp.ge.f32.partialorder %v621_v32, 0.0  ;;  %v895_v41 = vmul.f32 0.2, %v621_v32  ;;  %v625_v42 = vpop.f32.mrf.mxu0  ;;  %v753_v43 = vpop.f32.mrf.mxu1  ;;  %1770 = vst [vmem:[%s2073_s29 + $0xa0] sm:$0xff] %v1694_v36   ;;  %v613_v45 = vadd.f32 %v2058_v35, %v612_v25 }
  0xfb   : > { %vm863_vm14 = vcmp.ge.f32.partialorder %v749_v39, 0.0  ;;  %v927_v44 = vmul.f32 0.2, %v749_v39  ;;  %v741_v46 = vadd.f32 %v2058_v35, %v740_v26  ;;  %v988_v47 = vsel %vm860_vm12, %v738_v31, %v924_v40 }
  0xfc   : > { %v959_v48 = vsel %vm831_vm13, %v621_v32, %v895_v41  ;;  %v634_v49 = vadd.f32 %v1841_v33, %v2058_v35  ;;  %v762_v50 = vadd.f32 %v1873_v34, %v2058_v35  ;;  %v1842_v51 = vpop.f32.mrf.mxu0  ;;  %v1874_v52 = vpop.f32.mrf.mxu1  ;;  %vm829_vm15 = vcmp.ge.f32.partialorder %v613_v45, 0.0 }
  0xfd   : > { %v1629_v53 = vpack.c.bf16 %v959_v48, %v958_v30  ;;  %v991_v54 = vsel %vm863_vm14, %v749_v39, %v927_v44  ;;  %v893_v55 = vmul.f32 0.2, %v613_v45  ;;  %vm861_vm0 = vcmp.ge.f32.partialorder %v741_v46, 0.0 }
  0xfe   : > { %v1709_v56 = vpack.c.bf16 %v991_v54, %v990_v37  ;;  %v925_v57 = vmul.f32 0.2, %v741_v46  ;;  %vm834_vm1 = vcmp.ge.f32.partialorder %v634_v49, 0.0  ;;  %v628_v58 = vpop.f32.mrf.mxu0  ;;  %v756_v59 = vpop.f32.mrf.mxu1  ;;  %v898_v61 = vmul.f32 0.2, %v634_v49 }
  0xff   : > { %1757 = vst [vmem:[%s2073_s29 + $0x38] sm:$0xff] %v1629_v53   ;;  %v957_v60 = vsel %vm829_vm15, %v613_v45, %v893_v55  ;;  %vm866_vm2 = vcmp.ge.f32.partialorder %v762_v50, 0.0  ;;  %v930_v62 = vmul.f32 0.2, %v762_v50  ;;  %v626_v1 = vadd.f32 %v2058_v35, %v625_v42 }
 0x100   : > { %1773 = vst [vmem:[%s2073_s29 + $0xb8] sm:$0xff] %v1709_v56   ;;  %v1624_v63 = vpack.c.bf16 %v957_v60, %v956_v38  ;;  %v989_v0 = vsel %vm861_vm0, %v741_v46, %v925_v57  ;;  %v754_v2 = vadd.f32 %v2058_v35, %v753_v43  ;;  %v1845_v3 = vpop.f32.mrf.mxu0  ;;  %v1877_v4 = vpop.f32.mrf.mxu1  ;;  %v962_v6 = vsel %vm834_vm1, %v634_v49, %v898_v61 }
 0x101   : > { %v1704_v5 = vpack.c.bf16 %v989_v0, %v988_v47  ;;  %v994_v7 = vsel %vm866_vm2, %v762_v50, %v930_v62  ;;  %v637_v8 = vadd.f32 %v1842_v51, %v2058_v35  ;;  %vm832_vm3 = vcmp.ge.f32.partialorder %v626_v1, 0.0 }
 0x102   : > { %1756 = vst [vmem:[%s2073_s29 + $0x30] sm:$0xff] %v1624_v63   ;;  %v896_v9 = vmul.f32 0.2, %v626_v1  ;;  %vm864_vm4 = vcmp.ge.f32.partialorder %v754_v2, 0.0  ;;  %v928_v10 = vmul.f32 0.2, %v754_v2  ;;  %v641_v11 = vpop.f32.mrf.mxu0  ;;  %v769_v12 = vpop.f32.mrf.mxu1  ;;  %v765_v14 = vadd.f32 %v1874_v52, %v2058_v35 }
 0x103   : > { %1772 = vst [vmem:[%s2073_s29 + $0xb0] sm:$0xff] %v1704_v5   ;;  %vm835_vm5 = vcmp.ge.f32.partialorder %v637_v8, 0.0  ;;  %v899_v13 = vmul.f32 0.2, %v637_v8  ;;  %v629_v15 = vadd.f32 %v2058_v35, %v628_v58  ;;  %v757_v18 = vadd.f32 %v2058_v35, %v756_v59 }
 0x104   : > { %v960_v16 = vsel %vm832_vm3, %v626_v1, %v896_v9  ;;  %v992_v17 = vsel %vm864_vm4, %v754_v2, %v928_v10  ;;  %v650_v19 = vadd.f32 %v1845_v3, %v2058_v35  ;;  %v1846_v20 = vpop.f32.mrf.mxu0  ;;  %v1878_v21 = vpop.f32.mrf.mxu1  ;;  %vm867_vm6 = vcmp.ge.f32.partialorder %v765_v14, 0.0 }
 0x105   : > { %v963_v22 = vsel %vm835_vm5, %v637_v8, %v899_v13  ;;  %v931_v23 = vmul.f32 0.2, %v765_v14  ;;  %vm833_vm7 = vcmp.ge.f32.partialorder %v629_v15, 0.0  ;;  %v897_v25 = vmul.f32 0.2, %v629_v15 }
 0x106   : > { %v1639_v24 = vpack.c.bf16 %v963_v22, %v962_v6  ;;  %vm865_vm8 = vcmp.ge.f32.partialorder %v757_v18, 0.0  ;;  %v929_v26 = vmul.f32 0.2, %v757_v18  ;;  %v644_v27 = vpop.f32.mrf.mxu0  ;;  %v772_v28 = vpop.f32.mrf.mxu1  ;;  %vm838_vm9 = vcmp.ge.f32.partialorder %v650_v19, 0.0 }
 0x107   : > { %v995_v29 = vsel %vm867_vm6, %v765_v14, %v931_v23  ;;  %v902_v30 = vmul.f32 0.2, %v650_v19  ;;  %v778_v31 = vadd.f32 %v1877_v4, %v2058_v35  ;;  %v961_v33 = vsel %vm833_vm7, %v629_v15, %v897_v25 }
 0x108   : > { %1759 = vst [vmem:[%s2073_s29 + $0x48] sm:$0xff] %v1639_v24   ;;  %v1719_v32 = vpack.c.bf16 %v995_v29, %v994_v7  ;;  %v993_v34 = vsel %vm865_vm8, %v757_v18, %v929_v26  ;;  %v642_v36 = vadd.f32 %v2058_v35, %v641_v11  ;;  %v1849_v37 = vpop.f32.mrf.mxu0  ;;  %v1881_v38 = vpop.f32.mrf.mxu1  ;;  %v1634_v39 = vpack.c.bf16 %v961_v33, %v960_v16 }
 0x109   : > { %v1714_v40 = vpack.c.bf16 %v993_v34, %v992_v17  ;;  %v966_v41 = vsel %vm838_vm9, %v650_v19, %v902_v30  ;;  %vm870_vm10 = vcmp.ge.f32.partialorder %v778_v31, 0.0  ;;  %v934_v42 = vmul.f32 0.2, %v778_v31 }
 0x10a   : > { %1775 = vst [vmem:[%s2073_s29 + $0xc8] sm:$0xff] %v1719_v32   ;;  %vm836_vm11 = vcmp.ge.f32.partialorder %v642_v36, 0.0  ;;  %v900_v43 = vmul.f32 0.2, %v642_v36  ;;  %v770_v44 = vadd.f32 %v2058_v35, %v769_v12  ;;  %v657_v45 = vpop.f32.mrf.mxu0  ;;  %v785_v46 = vpop.f32.mrf.mxu1  ;;  %1758 = vst [vmem:[%s2073_s29 + $0x40] sm:$0xff] %v1634_v39   ;;  %v653_v47 = vadd.f32 %v1846_v20, %v2058_v35 }
 0x10b   : > { %1774 = vst [vmem:[%s2073_s29 + $0xc0] sm:$0xff] %v1714_v40   ;;  %v781_v48 = vadd.f32 %v1878_v21, %v2058_v35  ;;  %v645_v49 = vadd.f32 %v2058_v35, %v644_v27  ;;  %v773_v50 = vadd.f32 %v2058_v35, %v772_v28  ;;  %v998_v51 = vsel %vm870_vm10, %v778_v31, %v934_v42 }
 0x10c   : > { %v964_v52 = vsel %vm836_vm11, %v642_v36, %v900_v43  ;;  %vm868_vm12 = vcmp.ge.f32.partialorder %v770_v44, 0.0  ;;  %v932_v53 = vmul.f32 0.2, %v770_v44  ;;  %v1850_v54 = vpop.f32.mrf.mxu0  ;;  %v1882_v55 = vpop.f32.mrf.mxu1  ;;  %vm839_vm13 = vcmp.ge.f32.partialorder %v653_v47, 0.0 }
 0x10d   : > { %v903_v56 = vmul.f32 0.2, %v653_v47  ;;  %vm871_vm14 = vcmp.ge.f32.partialorder %v781_v48, 0.0  ;;  %v935_v57 = vmul.f32 0.2, %v781_v48  ;;  %vm837_vm15 = vcmp.ge.f32.partialorder %v645_v49, 0.0 }
 0x10e   : > { %v996_v58 = vsel %vm868_vm12, %v770_v44, %v932_v53  ;;  %v901_v59 = vmul.f32 0.2, %v645_v49  ;;  %vm869_vm0 = vcmp.ge.f32.partialorder %v773_v50, 0.0  ;;  %v660_v60 = vpop.f32.mrf.mxu0  ;;  %v788_v61 = vpop.f32.mrf.mxu1  ;;  %v933_v0 = vmul.f32 0.2, %v773_v50 }
 0x10f   : > { %v967_v62 = vsel %vm839_vm13, %v653_v47, %v903_v56  ;;  %v999_v63 = vsel %vm871_vm14, %v781_v48, %v935_v57  ;;  %v666_v1 = vadd.f32 %v1849_v37, %v2058_v35  ;;  %v794_v5 = vadd.f32 %v1881_v38, %v2058_v35 }
 0x110   : > { %v1649_v2 = vpack.c.bf16 %v967_v62, %v966_v41  ;;  %v1729_v3 = vpack.c.bf16 %v999_v63, %v998_v51  ;;  %v965_v4 = vsel %vm837_vm15, %v645_v49, %v901_v59  ;;  %v1853_v6 = vpop.f32.mrf.mxu0  ;;  %v1885_v7 = vpop.f32.mrf.mxu1  ;;  %v997_v9 = vsel %vm869_vm0, %v773_v50, %v933_v0 }
 0x111   : > { %v1644_v8 = vpack.c.bf16 %v965_v4, %v964_v52  ;;  %vm842_vm1 = vcmp.ge.f32.partialorder %v666_v1, 0.0  ;;  %v906_v10 = vmul.f32 0.2, %v666_v1  ;;  %v1724_v11 = vpack.c.bf16 %v997_v9, %v996_v58 }
 0x112   : > { %1761 = vst [vmem:[%s2073_s29 + $0x58] sm:$0xff] %v1649_v2   ;;  %1777 = vst [vmem:[%s2073_s29 + $0xd8] sm:$0xff] %v1729_v3   ;;  %vm874_vm2 = vcmp.ge.f32.partialorder %v794_v5, 0.0  ;;  %v938_v12 = vmul.f32 0.2, %v794_v5  ;;  %v658_v13 = vadd.f32 %v2058_v35, %v657_v45  ;;  %v786_v14 = vadd.f32 %v2058_v35, %v785_v46  ;;  %v673_v20 = vpop.f32.mrf.mxu0  ;;  %v801_v21 = vpop.f32.mrf.mxu1 }
 0x113   : > { %1760 = vst [vmem:[%s2073_s29 + $0x50] sm:$0xff] %v1644_v8   ;;  %v669_v15 = vadd.f32 %v1850_v54, %v2058_v35  ;;  %v797_v16 = vadd.f32 %v1882_v55, %v2058_v35  ;;  %1776 = vst [vmem:[%s2073_s29 + $0xd0] sm:$0xff] %v1724_v11   ;;  %v970_v17 = vsel %vm842_vm1, %v666_v1, %v906_v10 }
 0x114   : > { %vm840_vm3 = vcmp.ge.f32.partialorder %v658_v13, 0.0  ;;  %v904_v18 = vmul.f32 0.2, %v658_v13  ;;  %v661_v19 = vadd.f32 %v2058_v35, %v660_v60  ;;  %v1002_v22 = vsel %vm874_vm2, %v794_v5, %v938_v12  ;;  %v1854_v34 = vpop.f32.mrf.mxu0  ;;  %v1886_v36 = vpop.f32.mrf.mxu1 }
 0x115   : > { %vm872_vm4 = vcmp.ge.f32.partialorder %v786_v14, 0.0  ;;  %vm843_vm5 = vcmp.ge.f32.partialorder %v669_v15, 0.0  ;;  %v907_v23 = vmul.f32 0.2, %v669_v15  ;;  %v936_v24 = vmul.f32 0.2, %v786_v14 }
 0x116   : > { %vm875_vm6 = vcmp.ge.f32.partialorder %v797_v16, 0.0  ;;  %v939_v25 = vmul.f32 0.2, %v797_v16  ;;  %vm841_vm7 = vcmp.ge.f32.partialorder %v661_v19, 0.0  ;;  %v968_v26 = vsel %vm840_vm3, %v658_v13, %v904_v18  ;;  %v676_v50 = vpop.f32.mrf.mxu0  ;;  %v804_v51 = vpop.f32.mrf.mxu1 }
 0x117   : > { %v971_v27 = vsel %vm843_vm5, %v669_v15, %v907_v23  ;;  %v905_v28 = vmul.f32 0.2, %v661_v19  ;;  %v789_v29 = vadd.f32 %v2058_v35, %v788_v61  ;;  %v682_v32 = vadd.f32 %v1853_v6, %v2058_v35 }
 0x118   : > { %v1659_v30 = vpack.c.bf16 %v971_v27, %v970_v17  ;;  %v1003_v31 = vsel %vm875_vm6, %v797_v16, %v939_v25  ;;  %v810_v33 = vadd.f32 %v1885_v7, %v2058_v35  ;;  %v1000_v40 = vsel %vm872_vm4, %v786_v14, %v936_v24 }
 0x119   : > { %v1739_v37 = vpack.c.bf16 %v1003_v31, %v1002_v22  ;;  %v969_v38 = vsel %vm841_vm7, %v661_v19, %v905_v28  ;;  %vm873_vm8 = vcmp.ge.f32.partialorder %v789_v29, 0.0  ;;  %v937_v39 = vmul.f32 0.2, %v789_v29 }
 0x11a   : > { %1763 = vst [vmem:[%s2073_s29 + $0x68] sm:$0xff] %v1659_v30   ;;  %v1654_v41 = vpack.c.bf16 %v969_v38, %v968_v26  ;;  %vm846_vm9 = vcmp.ge.f32.partialorder %v682_v32, 0.0  ;;  %v910_v42 = vmul.f32 0.2, %v682_v32  ;;  %vm878_vm10 = vcmp.ge.f32.partialorder %v810_v33, 0.0 }
 0x11b   : > { %1779 = vst [vmem:[%s2073_s29 + $0xe8] sm:$0xff] %v1739_v37   ;;  %v1001_v43 = vsel %vm873_vm8, %v789_v29, %v937_v39  ;;  %v942_v44 = vmul.f32 0.2, %v810_v33  ;;  %v674_v45 = vadd.f32 %v2058_v35, %v673_v20  ;;  %v802_v47 = vadd.f32 %v2058_v35, %v801_v21 }
 0x11c   : > { %1762 = vst [vmem:[%s2073_s29 + $0x60] sm:$0xff] %v1654_v41   ;;  %v1734_v46 = vpack.c.bf16 %v1001_v43, %v1000_v40  ;;  %v685_v48 = vadd.f32 %v1854_v34, %v2058_v35  ;;  %v813_v49 = vadd.f32 %v1886_v36, %v2058_v35  ;;  %v974_v52 = vsel %vm846_vm9, %v682_v32, %v910_v42 }
 0x11d   : > { %v1006_v53 = vsel %vm878_vm10, %v810_v33, %v942_v44  ;;  %v908_v55 = vmul.f32 0.2, %v674_v45  ;;  %v677_v57 = vadd.f32 %v2058_v35, %v676_v50  ;;  %v805_v58 = vadd.f32 %v2058_v35, %v804_v51 }
 0x11e   : > { %1778 = vst [vmem:[%s2073_s29 + $0xe0] sm:$0xff] %v1734_v46   ;;  %vm847_vm11 = vcmp.ge.f32.partialorder %v685_v48, 0.0  ;;  %v911_v54 = vmul.f32 0.2, %v685_v48  ;;  %vm879_vm12 = vcmp.ge.f32.partialorder %v813_v49, 0.0  ;;  %vm844_vm13 = vcmp.ge.f32.partialorder %v674_v45, 0.0 }
 0x11f   : > { %v943_v56 = vmul.f32 0.2, %v813_v49  ;;  %vm876_vm14 = vcmp.ge.f32.partialorder %v802_v47, 0.0  ;;  %v940_v59 = vmul.f32 0.2, %v802_v47  ;;  %vm845_vm15 = vcmp.ge.f32.partialorder %v677_v57, 0.0 }
 0x120   : > { %v975_v60 = vsel %vm847_vm11, %v685_v48, %v911_v54  ;;  %v909_v63 = vmul.f32 0.2, %v677_v57  ;;  %vm877_vm0 = vcmp.ge.f32.partialorder %v805_v58, 0.0  ;;  %v941_v1 = vmul.f32 0.2, %v805_v58 }
 0x121   : > { %v1669_v61 = vpack.c.bf16 %v975_v60, %v974_v52  ;;  %v1007_v62 = vsel %vm879_vm12, %v813_v49, %v943_v56  ;;  %v972_v2 = vsel %vm844_vm13, %v674_v45, %v908_v55  ;;  %v1004_v4 = vsel %vm876_vm14, %v802_v47, %v940_v59 }
 0x122   : > { %v1749_v0 = vpack.c.bf16 %v1007_v62, %v1006_v53  ;;  %v973_v3 = vsel %vm845_vm15, %v677_v57, %v909_v63  ;;  %v1005_v5 = vsel %vm877_vm0, %v805_v58, %v941_v1 }
 0x123   : > { %1765 = vst [vmem:[%s2073_s29 + $0x78] sm:$0xff] %v1669_v61   ;;  %v1664_v35 = vpack.c.bf16 %v973_v3, %v972_v2  ;;  %v1744_v6 = vpack.c.bf16 %v1005_v5, %v1004_v4 }
 0x124   : > { %1781 = vst [vmem:[%s2073_s29 + $0xf8] sm:$0xff] %v1749_v0  }
 0x125   : > { %1764 = vst [vmem:[%s2073_s29 + $0x70] sm:$0xff] %v1664_v35   ;;  %1780 = vst [vmem:[%s2073_s29 + $0xf0] sm:$0xff] %v1744_v6  }
 0x126 PF: > { %s13_s12 = sadd.s32 1, %s1942_s12  }
 0x127   : > { %p10_p4 = scmp.ge.s32.totalorder %s13_s12, 6  }
 0x129   :  { %12 = sbr.rel (!%p10_p4) target bundleno = 1 (0x1), region = 62 }

// kernel: _lambda_.6
= control target key start
LH: loop header
LB: loop body
LE: loop exit
PB: predicated region body
PF: predicated region fallthrough
CT: control target
= control target key end

     0   :  { %s1469_s15 = smov 0   ;;  %s2081_s0 = inlined_call_operand.vmem [shape: bf16[2,256,128], index: 0, kind: input, shape index: {}]   ;;  %s2082_s1 = inlined_call_operand.vmem [shape: bf16[128,128], index: 1, kind: input, shape index: {}]   ;;  %s2083_s2 = inlined_call_operand.vmem [shape: f32[1,128], index: 2, kind: input, shape index: {}]   ;;  %s2084_s3 = inlined_call_operand.vmem [shape: f32[1,128], index: 3, kind: input, shape index: {}]   ;;  %s2085_s4 = inlined_call_operand.vmem [shape: bf16[2,256,128], index: 4, kind: output, shape index: {}]  }
   0x1 LB: > { %s1116_s16 = sadd.s32 4294967295, %s1442_s15   ;;  %p1120_p0 = scmp.ge.s32.totalorder %s1442_s15, 1  ;;  %s1442_s15 = sphi %s1469_s15, %s14_s15  }
   0x2   : > { %p162_p1 = scmp.lt.s32.totalorder %s1442_s15, 3 }
   0x4   : > { %p163_p2 = pnand %p1120_p0, %p162_p1 }
   0x5   : > { %p188_p3 = scmp.lt.s32.totalorder (!%p163_p2), %s1116_s16, 1 }
   0x6   : > { %166 = sbr.rel (%p163_p2) target bundleno = 473 (0x1d9), region = 36 }
   0xb   : > { %v1410_v0 = vld [vmem:[%s2082_s1 + $0x38] sm:$0xff]   ;;  %v1411_v1 = vld [vmem:[%s2082_s1 + $0x30] sm:$0xff]   ;;  %s2101_s16 = smov (!%p188_p3, %s1116_s16), 1  ;;  %v1412_v2 = vld [vmem:[%s2082_s1 + $0x28] sm:$0xff]  }
   0xc   : > { %1338 = vmatprep.subr.bf16.mxu0 %v1410_v0  ;;  %1386 = vmatprep.subr.bf16.mxu1 %v1410_v0  ;;  %s1185_s23 = sshll.u32 %s2101_s16, 7  ;;  %v1413_v3 = vld [vmem:[%s2082_s1 + $0x20] sm:$0xff]   ;;  %v1414_v5 = vld [vmem:[%s2082_s1 + $0x18] sm:$0xff]   ;;  %v1415_v6 = vld [vmem:[%s2082_s1 + $0x10] sm:$0xff]  }
   0xd   : > { %1339 = vmatpush3.bf16.msra.mxu0 %v1410_v0  ;;  %1394 = vmatpush3.bf16.msra.mxu1 %v1410_v0  ;;  %s1494_s26 = scalar_lea.vmem %s2081_s0, %s1185_s23  ;;  %v1416_v8 = vld [vmem:[%s2082_s1 + $0x8] sm:$0xff]   ;;  %v1417_v9 = vld [vmem:[%s2082_s1] sm:$0xff]   ;;  %s2040_s19 = scalar_lea.vmem %s2085_s4, %s1185_s23 }
   0xe   : > { %1340 = vmatprep.subr.bf16.mxu0 %v1411_v1  ;;  %1387 = vmatprep.subr.bf16.mxu1 %v1411_v1  ;;  %v1418_v4 = vld [vmem:[%s1494_s26] sm:$0xff]   ;;  %v1419_v10 = vld [vmem:[%s1494_s26 + $0x8] sm:$0xff]   ;;  %v1420_v12 = vld [vmem:[%s1494_s26 + $0x10] sm:$0xff]  }
   0xf   : > { %1354 = vmatprep.mubr.bf16.mxu0 %v1418_v4  ;;  %v1426_v7 = vld [vmem:[%s1494_s26 + $0x40] sm:$0xff]   ;;  %v1427_v11 = vld [vmem:[%s1494_s26 + $0x48] sm:$0xff]   ;;  %v1428_v13 = vld [vmem:[%s1494_s26 + $0x50] sm:$0xff]  }
  0x10   : > { %1370 = vmatprep.mubr.bf16.mxu1 %v1426_v7  ;;  %v1421_v14 = vld [vmem:[%s1494_s26 + $0x18] sm:$0xff]   ;;  %v1422_v16 = vld [vmem:[%s1494_s26 + $0x20] sm:$0xff]   ;;  %v1423_v18 = vld [vmem:[%s1494_s26 + $0x28] sm:$0xff]  }
  0x11   : > { %1341 = vmatpush3.bf16.msra.mxu0 %v1411_v1  ;;  %1395 = vmatpush3.bf16.msra.mxu1 %v1411_v1  ;;  %v1429_v15 = vld [vmem:[%s1494_s26 + $0x58] sm:$0xff]   ;;  %v1430_v17 = vld [vmem:[%s1494_s26 + $0x60] sm:$0xff]   ;;  %v1431_v19 = vld [vmem:[%s1494_s26 + $0x68] sm:$0xff]  }
  0x12   : > { %1342 = vmatprep.subr.bf16.mxu0 %v1412_v2  ;;  %1388 = vmatprep.subr.bf16.mxu1 %v1412_v2  ;;  %v1424_v20 = vld [vmem:[%s1494_s26 + $0x30] sm:$0xff]   ;;  %v1425_v22 = vld [vmem:[%s1494_s26 + $0x38] sm:$0xff]  }
  0x13   : > { %v1432_v21 = vld [vmem:[%s1494_s26 + $0x70] sm:$0xff]   ;;  %v1433_v23 = vld [vmem:[%s1494_s26 + $0x78] sm:$0xff]  }
  0x15   : > { %1343 = vmatpush3.bf16.msra.mxu0 %v1412_v2  ;;  %1396 = vmatpush3.bf16.msra.mxu1 %v1412_v2 }
  0x16   : > { %1344 = vmatprep.subr.bf16.mxu0 %v1413_v3  ;;  %1389 = vmatprep.subr.bf16.mxu1 %v1413_v3 }
  0x19   : > { %1345 = vmatpush3.bf16.msra.mxu0 %v1413_v3  ;;  %1397 = vmatpush3.bf16.msra.mxu1 %v1413_v3 }
  0x1a   : > { %1346 = vmatprep.subr.bf16.mxu0 %v1414_v5  ;;  %1390 = vmatprep.subr.bf16.mxu1 %v1414_v5 }
  0x1d   : > { %1347 = vmatpush3.bf16.msra.mxu0 %v1414_v5  ;;  %1398 = vmatpush3.bf16.msra.mxu1 %v1414_v5 }
  0x1e   : > { %1348 = vmatprep.subr.bf16.mxu0 %v1415_v6  ;;  %1391 = vmatprep.subr.bf16.mxu1 %v1415_v6 }
  0x21   : > { %1349 = vmatpush3.bf16.msra.mxu0 %v1415_v6  ;;  %1399 = vmatpush3.bf16.msra.mxu1 %v1415_v6 }
  0x22   : > { %1350 = vmatprep.subr.bf16.mxu0 %v1416_v8  ;;  %1392 = vmatprep.subr.bf16.mxu1 %v1416_v8 }
  0x25   : > { %1351 = vmatpush3.bf16.msra.mxu0 %v1416_v8  ;;  %1400 = vmatpush3.bf16.msra.mxu1 %v1416_v8 }
  0x26   : > { %1352 = vmatprep.subr.bf16.mxu0 %v1417_v9  ;;  %1393 = vmatprep.subr.bf16.mxu1 %v1417_v9 }
  0x29   : > { %1353 = vmatpush3.bf16.msra.mxu0 %v1417_v9  ;;  %1401 = vmatpush3.bf16.msra.mxu1 %v1417_v9 }
  0x2c   : > { %1355 = vmatmul.mubr.bf16.vlgmr.msra.gmra.mxu0 %v1419_v10  ;;  %1371 = vmatmul.mubr.bf16.vlgmr.msra.gmra.mxu1 %v1427_v11 }
  0x2d   : > { %1358 = vmatprep.mubr.bf16.mxu0 %v1420_v12  ;;  %1374 = vmatprep.mubr.bf16.mxu1 %v1428_v13 }
  0x34   : > { %1359 = vmatmul.mubr.bf16.gmra.mxu0 %v1421_v14  ;;  %1375 = vmatmul.mubr.bf16.gmra.mxu1 %v1429_v15 }
  0x35   : > { %1362 = vmatprep.mubr.bf16.mxu0 %v1422_v16  ;;  %1378 = vmatprep.mubr.bf16.mxu1 %v1430_v17 }
  0x3c   : > { %1363 = vmatmul.mubr.bf16.gmra.mxu0 %v1423_v18  ;;  %1379 = vmatmul.mubr.bf16.gmra.mxu1 %v1431_v19 }
  0x3d   : > { %1366 = vmatprep.mubr.bf16.mxu0 %v1424_v20  ;;  %1382 = vmatprep.mubr.bf16.mxu1 %v1432_v21 }
  0x44   : > { %1367 = vmatmul.mubr.bf16.gmra.mxu0 %v1425_v22  ;;  %1383 = vmatmul.mubr.bf16.gmra.mxu1 %v1433_v23 }
  0xec   : > { %v1527_v24 = vpop.f32.mrf.mxu0  ;;  %v1531_v26 = vpop.f32.mrf.mxu1 }
  0xee   : > { %v1529_v25 = vpop.f32.mrf.mxu0  ;;  %v1537_v29 = vpop.f32.mrf.mxu1 }
  0xf0   : > { %v1533_v27 = vpop.f32.mrf.mxu0  ;;  %v1546_v34 = vpop.f32.mrf.mxu1 }
  0xf2   : > { %v1535_v28 = vpop.f32.mrf.mxu0  ;;  %v1554_v39 = vpop.f32.mrf.mxu1 }
  0xf3   : > { %v552_v30 = vadd.f32 %v1535_v28, %v1529_v25 }
  0xf4   : > { %v1541_v31 = vpop.f32.mrf.mxu0  ;;  %v1562_v44 = vpop.f32.mrf.mxu1 }
  0xf5   : > { %v553_v32 = vadd.f32 %v1527_v24, %v552_v30 }
  0xf6   : > { %v1544_v33 = vpop.f32.mrf.mxu0  ;;  %v1570_v49 = vpop.f32.mrf.mxu1 }
  0xf7   : > { %v554_v35 = vadd.f32 %v1533_v27, %v553_v32 }
  0xf8   : > { %v1549_v36 = vpop.f32.mrf.mxu0  ;;  %v1578_v54 = vpop.f32.mrf.mxu1 }
  0xf9   : > { %v555_v37 = vadd.f32 %v554_v35, %v1544_v33 }
  0xfa   : > { %v1552_v38 = vpop.f32.mrf.mxu0  ;;  %v1586_v59 = vpop.f32.mrf.mxu1 }
  0xfb   : > { %v556_v40 = vadd.f32 %v555_v37, %v1552_v38 }
  0xfc   : > { %v1557_v41 = vpop.f32.mrf.mxu0  ;;  %v1590_v62 = vpop.f32.mrf.mxu1 }
  0xfd   : > { %v557_v42 = vadd.f32 %v1541_v31, %v556_v40 }
  0xfe   : > { %v1560_v43 = vpop.f32.mrf.mxu0  ;;  %v1594_v1 = vpop.f32.mrf.mxu1 }
  0xff   : > { %v558_v45 = vadd.f32 %v1549_v36, %v557_v42 }
 0x100   : > { %v1565_v46 = vpop.f32.mrf.mxu0  ;;  %v1598_v4 = vpop.f32.mrf.mxu1 }
 0x101   : > { %v559_v47 = vadd.f32 %v558_v45, %v1560_v43 }
 0x102   : > { %v1568_v48 = vpop.f32.mrf.mxu0  ;;  %v1602_v7 = vpop.f32.mrf.mxu1 }
 0x103   : > { %v560_v50 = vadd.f32 %v559_v47, %v1568_v48 }
 0x104   : > { %v1573_v51 = vpop.f32.mrf.mxu0  ;;  %v1606_v10 = vpop.f32.mrf.mxu1 }
 0x105   : > { %v561_v52 = vadd.f32 %v1557_v41, %v560_v50 }
 0x106   : > { %v1576_v53 = vpop.f32.mrf.mxu0  ;;  %v1610_v13 = vpop.f32.mrf.mxu1 }
 0x107   : > { %v562_v55 = vadd.f32 %v1565_v46, %v561_v52 }
 0x108   : > { %v1581_v56 = vpop.f32.mrf.mxu0  ;;  %v1614_v16 = vpop.f32.mrf.mxu1 }
 0x109   : > { %v563_v57 = vadd.f32 %v562_v55, %v1576_v53 }
 0x10a   : > { %v1584_v58 = vpop.f32.mrf.mxu0  ;;  %v1618_v19 = vpop.f32.mrf.mxu1 }
 0x10b   : > { %v564_v60 = vadd.f32 %v563_v57, %v1584_v58 }
 0x10d   : > { %v565_v61 = vadd.f32 %v1573_v51, %v564_v60 }
 0x10f   : > { %v566_v63 = vadd.f32 %v1581_v56, %v565_v61 }
 0x111   : > { %v567_v0 = vadd.f32 %v566_v63, %v1537_v29 }
 0x113   : > { %v568_v2 = vadd.f32 %v567_v0, %v1554_v39 }
 0x115   : > { %v569_v3 = vadd.f32 %v1531_v26, %v568_v2 }
 0x117   : > { %v570_v5 = vadd.f32 %v1546_v34, %v569_v3 }
 0x119   : > { %v571_v6 = vadd.f32 %v570_v5, %v1570_v49 }
 0x11b   : > { %v572_v8 = vadd.f32 %v571_v6, %v1586_v59 }
 0x11d   : > { %v573_v9 = vadd.f32 %v1562_v44, %v572_v8 }
 0x11f   : > { %v574_v11 = vadd.f32 %v1578_v54, %v573_v9 }
 0x121   : > { %v575_v12 = vadd.f32 %v574_v11, %v1594_v1 }
 0x123   : > { %v576_v14 = vadd.f32 %v575_v12, %v1602_v7 }
 0x125   : > { %v577_v15 = vadd.f32 %v1590_v62, %v576_v14 }
 0x127   : > { %v578_v17 = vadd.f32 %v1598_v4, %v577_v15 }
 0x129   : > { %v579_v18 = vadd.f32 %v578_v17, %v1610_v13 }
 0x12b   : > { %v580_v20 = vadd.f32 %v579_v18, %v1618_v19 }
 0x12d   : > { %v581_v21 = vadd.f32 %v1606_v10, %v580_v20 }
 0x12f   : > { %v582_v22 = vadd.f32 %v1614_v16, %v581_v21 }
 0x131   : > { %v583_v23 = vrot.slane %v582_v22, 4 }
 0x133   : > { %v584_v30 = vadd.f32 %v583_v23, %v582_v22 }
 0x135   : > { %v585_v32 = vrot.slane %v584_v30, 2 }
 0x137   : > { %v586_v35 = vadd.f32 %v585_v32, %v584_v30 }
 0x139   : > { %v587_v37 = vrot.slane %v586_v35, 1 }
 0x13b   : > { %v588_v40 = vadd.f32 %v587_v37, %v586_v35 }
 0x13d   : > { %v1623_v42 = vmul.f32 0.00390625, %v588_v40 }
 0x13f   : > { %v1627_v45 = vsub.f32 %v1529_v25, %v1623_v42  ;;  %v1631_v47 = vsub.f32 %v1535_v28, %v1623_v42  ;;  %v1635_v50 = vsub.f32 %v1527_v24, %v1623_v42  ;;  %v1643_v57 = vsub.f32 %v1533_v27, %v1623_v42 }
 0x140   : > { %v1647_v25 = vsub.f32 %v1544_v33, %v1623_v42  ;;  %v1653_v24 = vsub.f32 %v1552_v38, %v1623_v42  ;;  %v1659_v27 = vsub.f32 %v1541_v31, %v1623_v42  ;;  %v1665_v2 = vsub.f32 %v1549_v36, %v1623_v42 }
 0x141   : > { %v623_v52 = vmul.f32 %v1627_v45, %v1627_v45  ;;  %v624_v55 = vmul.f32 %v1631_v47, %v1631_v47  ;;  %v625_v28 = vmul.f32 %v1635_v50, %v1635_v50  ;;  %v626_v61 = vmul.f32 %v1643_v57, %v1643_v57 }
 0x142   : > { %v627_v33 = vmul.f32 %v1647_v25, %v1647_v25  ;;  %v628_v38 = vmul.f32 %v1653_v24, %v1653_v24  ;;  %v1671_v5 = vsub.f32 %v1560_v43, %v1623_v42  ;;  %v629_v31 = vmul.f32 %v1659_v27, %v1659_v27 }
 0x143   : > { %v655_v60 = vadd.f32 %v624_v55, %v623_v52  ;;  %v1677_v8 = vsub.f32 %v1568_v48, %v1623_v42  ;;  %v630_v36 = vmul.f32 %v1665_v2, %v1665_v2  ;;  %v1683_v11 = vsub.f32 %v1557_v41, %v1623_v42 }
 0x144   : > { %v631_v43 = vmul.f32 %v1671_v5, %v1671_v5  ;;  %v1689_v14 = vsub.f32 %v1565_v46, %v1623_v42  ;;  %v1695_v17 = vsub.f32 %v1576_v53, %v1623_v42  ;;  %v1701_v20 = vsub.f32 %v1584_v58, %v1623_v42 }
 0x145   : > { %v656_v63 = vadd.f32 %v655_v60, %v625_v28  ;;  %v632_v48 = vmul.f32 %v1677_v8, %v1677_v8  ;;  %v633_v41 = vmul.f32 %v1683_v11, %v1683_v11  ;;  %v1707_v22 = vsub.f32 %v1573_v51, %v1623_v42 }
 0x146   : > { %v634_v46 = vmul.f32 %v1689_v14, %v1689_v14  ;;  %v635_v53 = vmul.f32 %v1695_v17, %v1695_v17  ;;  %v1713_v30 = vsub.f32 %v1581_v56, %v1623_v42  ;;  %v636_v58 = vmul.f32 %v1701_v20, %v1701_v20 }
 0x147   : > { %v657_v0 = vadd.f32 %v656_v63, %v626_v61  ;;  %v1719_v35 = vsub.f32 %v1537_v29, %v1623_v42  ;;  %v637_v51 = vmul.f32 %v1707_v22, %v1707_v22  ;;  %v608_v40 = vsub.f32 %v1554_v39, %v1623_v42 }
 0x148   : > { %v638_v52 = vmul.f32 %v1713_v30, %v1713_v30  ;;  %v1729_v55 = vsub.f32 %v1531_v26, %v1623_v42  ;;  %v1735_v60 = vsub.f32 %v1546_v34, %v1623_v42  ;;  %v1739_v39 = vsub.f32 %v1570_v49, %v1623_v42 }
 0x149   : > { %v658_v3 = vadd.f32 %v657_v0, %v627_v33  ;;  %v639_v28 = vmul.f32 %v1719_v35, %v1719_v35  ;;  %v640_v61 = vmul.f32 %v608_v40, %v608_v40  ;;  %v1745_v26 = vsub.f32 %v1586_v59, %v1623_v42 }
 0x14a   : > { %v641_v33 = vmul.f32 %v1729_v55, %v1729_v55  ;;  %v1751_v34 = vsub.f32 %v1562_v44, %v1623_v42  ;;  %v643_v49 = vmul.f32 %v1739_v39, %v1739_v39 }
 0x14b   : > { %v659_v6 = vadd.f32 %v658_v3, %v628_v38  ;;  %v642_v38 = vmul.f32 %v1735_v60, %v1735_v60  ;;  %v644_v59 = vmul.f32 %v1745_v26, %v1745_v26 }
 0x14c   : > { %v645_v44 = vmul.f32 %v1751_v34, %v1751_v34 }
 0x14d   : > { %v660_v9 = vadd.f32 %v659_v6, %v629_v31  ;;  %v1757_v6 = vsub.f32 %v1578_v54, %v1623_v42 }
 0x14f   : > { %v661_v12 = vadd.f32 %v660_v9, %v630_v36  ;;  %v1763_v9 = vsub.f32 %v1594_v1, %v1623_v42  ;;  %v646_v54 = vmul.f32 %v1757_v6, %v1757_v6 }
 0x151   : > { %v662_v15 = vadd.f32 %v661_v12, %v631_v43  ;;  %v1769_v12 = vsub.f32 %v1602_v7, %v1623_v42  ;;  %v647_v1 = vmul.f32 %v1763_v9, %v1763_v9 }
 0x153   : > { %v663_v18 = vadd.f32 %v662_v15, %v632_v48  ;;  %v1775_v15 = vsub.f32 %v1590_v62, %v1623_v42  ;;  %v620_v62 = vsub.f32 %v1618_v19, %v1623_v42 }
 0x155   : > { %v664_v21 = vadd.f32 %v663_v18, %v633_v41  ;;  %v618_v18 = vsub.f32 %v1598_v4, %v1623_v42 }
 0x157   : > { %v665_v23 = vadd.f32 %v664_v21, %v634_v46  ;;  %v648_v46 = vmul.f32 %v1769_v12, %v1769_v12  ;;  %v619_v21 = vsub.f32 %v1610_v13, %v1623_v42 }
 0x159   : > { %v666_v32 = vadd.f32 %v665_v23, %v635_v53  ;;  %v649_v53 = vmul.f32 %v1775_v15, %v1775_v15  ;;  %v651_v4 = vmul.f32 %v619_v21, %v619_v21 }
 0x15b   : > { %v667_v37 = vadd.f32 %v666_v32, %v636_v58  ;;  %v650_v58 = vmul.f32 %v618_v18, %v618_v18 }
 0x15d   : > { %v668_v56 = vadd.f32 %v667_v37, %v637_v51  ;;  %v621_v51 = vsub.f32 %v1606_v10, %v1623_v42 }
 0x15f   : > { %v669_v29 = vadd.f32 %v668_v56, %v638_v52  ;;  %v622_v52 = vsub.f32 %v1614_v16, %v1623_v42  ;;  %v652_v56 = vmul.f32 %v620_v62, %v620_v62  ;;  %v653_v13 = vmul.f32 %v621_v51, %v621_v51 }
 0x161   : > { %v670_v63 = vadd.f32 %v669_v29, %v639_v28 }
 0x163   : > { %v671_v0 = vadd.f32 %v670_v63, %v640_v61  ;;  %v654_v61 = vmul.f32 %v622_v52, %v622_v52 }
 0x165   : > { %v672_v3 = vadd.f32 %v671_v0, %v641_v33 }
 0x167   : > { %v673_v31 = vadd.f32 %v672_v3, %v642_v38 }
 0x169   : > { %v674_v36 = vadd.f32 %v673_v31, %v643_v49 }
 0x16b   : > { %v675_v43 = vadd.f32 %v674_v36, %v644_v59 }
 0x16d   : > { %v676_v48 = vadd.f32 %v675_v43, %v645_v44 }
 0x16f   : > { %v677_v41 = vadd.f32 %v676_v48, %v646_v54 }
 0x171   : > { %v678_v7 = vadd.f32 %v677_v41, %v647_v1 }
 0x173   : > { %v679_v23 = vadd.f32 %v678_v7, %v648_v46 }
 0x175   : > { %v680_v32 = vadd.f32 %v679_v23, %v649_v53 }
 0x177   : > { %v681_v37 = vadd.f32 %v680_v32, %v650_v58 }
 0x179   : > { %v682_v28 = vadd.f32 %v681_v37, %v651_v4 }
 0x17b   : > { %v683_v29 = vadd.f32 %v682_v28, %v652_v56 }
 0x17d   : > { %v684_v63 = vadd.f32 %v683_v29, %v653_v13 }
 0x17f   : > { %v685_v33 = vadd.f32 %v684_v63, %v654_v61 }
 0x181   : > { %v686_v0 = vrot.slane %v685_v33, 4 }
 0x183   : > { %v687_v38 = vadd.f32 %v686_v0, %v685_v33 }
 0x185   : > { %v688_v19 = vrot.slane %v687_v38, 2 }
 0x187   : > { %v689_v3 = vadd.f32 %v688_v19, %v687_v38  ;;  %v1150_v19 = vld [vmem:[%s2084_s3] ss:$0 sm:$0xff] }
 0x189   : > { %v690_v49 = vrot.slane %v689_v3, 1 }
 0x18b   : > { %v691_v31 = vadd.f32 %v690_v49, %v689_v3 }
 0x18d   : > { %v692_v59 = vmul.f32 0.00390625, %v691_v31 }
 0x18f   : > { %v693_v10 = vadd.f32 1e-05, %v692_v59 }
 0x191   : > { %1434 = vrsqrt.f32 %v693_v10 }
 0x19e   : > { %v1435_v36 = vpop.eup %1434 }
 0x19f   : > { %v712_v44 = vmul.f32 %v1435_v36, %v608_v40  ;;  %v695_v16 = vmul.f32 %v1435_v36, %v1627_v45  ;;  %v696_v42 = vmul.f32 %v1435_v36, %v1631_v47  ;;  %v697_v43 = vmul.f32 %v1435_v36, %v1635_v50 }
 0x1a0   : > { %v723_v54 = vmul.f32 %v1435_v36, %v619_v21  ;;  %v724_v48 = vmul.f32 %v1435_v36, %v620_v62  ;;  %v725_v1 = vmul.f32 %v1435_v36, %v621_v51  ;;  %v726_v41 = vmul.f32 %v1435_v36, %v622_v52 }
 0x1a1   : > { %v698_v46 = vmul.f32 %v1435_v36, %v1643_v57  ;;  %v699_v7 = vmul.f32 %v1435_v36, %v1647_v25  ;;  %v700_v53 = vmul.f32 %v1435_v36, %v1653_v24  ;;  %v701_v23 = vmul.f32 %v1435_v36, %v1659_v27 }
 0x1a2   : > { %v702_v40 = vmul.f32 %v1435_v36, %v1665_v2  ;;  %v703_v45 = vmul.f32 %v1435_v36, %v1671_v5  ;;  %v704_v47 = vmul.f32 %v1435_v36, %v1677_v8  ;;  %v705_v50 = vmul.f32 %v1435_v36, %v1683_v11  ;;  %v1149_v8 = vld [vmem:[%s2083_s2] ss:$0 sm:$0xff] }
 0x1a3   : > { %v706_v21 = vmul.f32 %v1435_v36, %v1689_v14  ;;  %v707_v62 = vmul.f32 %v1435_v36, %v1695_v17  ;;  %v708_v57 = vmul.f32 %v1435_v36, %v1701_v20  ;;  %v709_v25 = vmul.f32 %v1435_v36, %v1707_v22 }
 0x1a4   : > { %v710_v24 = vmul.f32 %v1435_v36, %v1713_v30  ;;  %v711_v27 = vmul.f32 %v1435_v36, %v1719_v35  ;;  %v713_v2 = vmul.f32 %v1435_v36, %v1729_v55  ;;  %v714_v5 = vmul.f32 %v1435_v36, %v1735_v60 }
 0x1a5   : > { %v715_v11 = vmul.f32 %v1435_v36, %v1739_v39  ;;  %v716_v14 = vmul.f32 %v1435_v36, %v1745_v26  ;;  %v717_v17 = vmul.f32 %v1435_v36, %v1751_v34  ;;  %v718_v20 = vmul.f32 %v1435_v36, %v1757_v6 }
 0x1a6   : > { %v719_v22 = vmul.f32 %v1435_v36, %v1763_v9  ;;  %v720_v30 = vmul.f32 %v1435_v36, %v1769_v12  ;;  %v721_v35 = vmul.f32 %v1435_v36, %v1775_v15  ;;  %v722_v55 = vmul.f32 %v1435_v36, %v618_v18 }
 0x1a7   : > { %v734_v60 = vmul.f32 %v1149_v8, %v695_v16  ;;  %v735_v58 = vmul.f32 %v1149_v8, %v696_v42  ;;  %v736_v32 = vmul.f32 %v1149_v8, %v697_v43  ;;  %v737_v51 = vmul.f32 %v1149_v8, %v698_v46 }
 0x1a8   : > { %v738_v4 = vmul.f32 %v1149_v8, %v699_v7  ;;  %v739_v37 = vmul.f32 %v1149_v8, %v700_v53  ;;  %v740_v39 = vmul.f32 %v1149_v8, %v701_v23  ;;  %v741_v52 = vmul.f32 %v1149_v8, %v702_v40 }
 0x1a9   : > { %v742_v26 = vmul.f32 %v1149_v8, %v703_v45  ;;  %v743_v56 = vmul.f32 %v1149_v8, %v704_v47  ;;  %v744_v34 = vmul.f32 %v1149_v8, %v705_v50  ;;  %v745_v28 = vmul.f32 %v1149_v8, %v706_v21 }
 0x1aa   : > { %v746_v6 = vmul.f32 %v1149_v8, %v707_v62  ;;  %v747_v13 = vmul.f32 %v1149_v8, %v708_v57  ;;  %v748_v9 = vmul.f32 %v1149_v8, %v709_v25  ;;  %v749_v29 = vmul.f32 %v1149_v8, %v710_v24 }
 0x1ab   : > { %v750_v12 = vmul.f32 %v1149_v8, %v711_v27  ;;  %v751_v61 = vmul.f32 %v1149_v8, %v712_v44  ;;  %v752_v15 = vmul.f32 %v1149_v8, %v713_v2  ;;  %v753_v18 = vmul.f32 %v1149_v8, %v714_v5 }
 0x1ac   : > { %v754_v63 = vmul.f32 %v1149_v8, %v715_v11  ;;  %v755_v33 = vmul.f32 %v1149_v8, %v716_v14  ;;  %v756_v0 = vmul.f32 %v1149_v8, %v717_v17  ;;  %v757_v38 = vmul.f32 %v1149_v8, %v718_v20 }
 0x1ad   : > { %v758_v3 = vmul.f32 %v1149_v8, %v719_v22  ;;  %v759_v49 = vmul.f32 %v1149_v8, %v720_v30  ;;  %v760_v31 = vmul.f32 %v1149_v8, %v721_v35  ;;  %v761_v59 = vmul.f32 %v1149_v8, %v722_v55 }
 0x1ae   : > { %v762_v10 = vmul.f32 %v1149_v8, %v723_v54  ;;  %v763_v36 = vmul.f32 %v1149_v8, %v724_v48  ;;  %v764_v16 = vmul.f32 %v1149_v8, %v725_v1  ;;  %v765_v42 = vmul.f32 %v1149_v8, %v726_v41 }
 0x1af   : > { %v1825_v43 = vadd.f32 %v1150_v19, %v734_v60  ;;  %v1827_v44 = vadd.f32 %v1150_v19, %v735_v58  ;;  %v1829_v46 = vadd.f32 %v1150_v19, %v736_v32  ;;  %v1831_v7 = vadd.f32 %v1150_v19, %v737_v51 }
 0x1b0   : > { %v1833_v53 = vadd.f32 %v1150_v19, %v738_v4  ;;  %v1835_v23 = vadd.f32 %v1150_v19, %v739_v37  ;;  %v1837_v40 = vadd.f32 %v1150_v19, %v740_v39  ;;  %v1839_v45 = vadd.f32 %v1150_v19, %v741_v52 }
 0x1b1   : > { %v1841_v54 = vadd.f32 %v1150_v19, %v742_v26  ;;  %v1843_v48 = vadd.f32 %v1150_v19, %v743_v56  ;;  %v1845_v1 = vadd.f32 %v1150_v19, %v744_v34  ;;  %v1847_v41 = vadd.f32 %v1150_v19, %v745_v28 }
 0x1b2   : > { %v1849_v47 = vadd.f32 %v1150_v19, %v746_v6  ;;  %v1851_v50 = vadd.f32 %v1150_v19, %v747_v13  ;;  %v1853_v21 = vadd.f32 %v1150_v19, %v748_v9  ;;  %v1855_v62 = vadd.f32 %v1150_v19, %v749_v29 }
 0x1b3   : > { %v1857_v57 = vadd.f32 %v1150_v19, %v750_v12  ;;  %v1859_v25 = vadd.f32 %v1150_v19, %v751_v61  ;;  %v1861_v24 = vadd.f32 %v1150_v19, %v752_v15  ;;  %v1863_v27 = vadd.f32 %v1150_v19, %v753_v18 }
 0x1b4   : > { %v1865_v2 = vadd.f32 %v1150_v19, %v754_v63  ;;  %v1867_v5 = vadd.f32 %v1150_v19, %v755_v33  ;;  %v1869_v8 = vadd.f32 %v1150_v19, %v756_v0  ;;  %v1871_v11 = vadd.f32 %v1150_v19, %v757_v38 }
 0x1b5   : > { %v1873_v14 = vadd.f32 %v1150_v19, %v758_v3  ;;  %v1875_v17 = vadd.f32 %v1150_v19, %v759_v49  ;;  %v1877_v20 = vadd.f32 %v1150_v19, %v760_v31  ;;  %v1879_v22 = vadd.f32 %v1150_v19, %v761_v59 }
 0x1b6   : > { %v1881_v30 = vadd.f32 %v1150_v19, %v762_v10  ;;  %v1883_v35 = vadd.f32 %v1150_v19, %v763_v36  ;;  %vm805_vm0 = vcmp.ge.f32.partialorder %v1825_v43, 0.0  ;;  %vm806_vm1 = vcmp.ge.f32.partialorder %v1827_v44, 0.0 }
 0x1b7   : > { %vm807_vm2 = vcmp.ge.f32.partialorder %v1829_v46, 0.0  ;;  %vm808_vm3 = vcmp.ge.f32.partialorder %v1831_v7, 0.0  ;;  %vm809_vm4 = vcmp.ge.f32.partialorder %v1833_v53, 0.0  ;;  %vm810_vm5 = vcmp.ge.f32.partialorder %v1835_v23, 0.0 }
 0x1b8   : > { %vm811_vm6 = vcmp.ge.f32.partialorder %v1837_v40, 0.0  ;;  %vm812_vm7 = vcmp.ge.f32.partialorder %v1839_v45, 0.0  ;;  %vm813_vm8 = vcmp.ge.f32.partialorder %v1841_v54, 0.0  ;;  %v1895_v55 = vadd.f32 %v1150_v19, %v764_v16 }
 0x1b9   : > { %v837_v60 = vmul.f32 0.2, %v1825_v43  ;;  %v838_v58 = vmul.f32 0.2, %v1827_v44  ;;  %v839_v32 = vmul.f32 0.2, %v1829_v46  ;;  %v1904_v51 = vadd.f32 %v1150_v19, %v765_v42 }
 0x1ba   : > { %vm820_vm15 = vcmp.ge.f32.partialorder %v1855_v62, 0.0  ;;  %vm821_vm10 = vcmp.ge.f32.partialorder %v1857_v57, 0.0  ;;  %v840_v4 = vmul.f32 0.2, %v1831_v7  ;;  %v841_v37 = vmul.f32 0.2, %v1833_v53 }
 0x1bb   : > { %v842_v39 = vmul.f32 0.2, %v1835_v23  ;;  %vm826_vm14 = vcmp.ge.f32.partialorder %v1867_v5, 0.0  ;;  %v843_v52 = vmul.f32 0.2, %v1837_v40  ;;  %v1923_v34 = vsel %vm805_vm0, %v1825_v43, %v837_v60 }
 0x1bc   : > { %v844_v26 = vmul.f32 0.2, %v1839_v45  ;;  %v845_v56 = vmul.f32 0.2, %v1841_v54  ;;  %vm830_vm9 = vcmp.ge.f32.partialorder %v1875_v17, 0.0  ;;  %v1935_v9 = vsel %vm806_vm1, %v1827_v44, %v838_v58 }
 0x1bd   : > { %v846_v28 = vmul.f32 0.2, %v1843_v48  ;;  %v847_v6 = vmul.f32 0.2, %v1845_v1  ;;  %v848_v13 = vmul.f32 0.2, %v1847_v41  ;;  %v871_v15 = vsel %vm807_vm2, %v1829_v46, %v839_v32 }
 0x1be   : > { %vm832_vm11 = vcmp.ge.f32.partialorder %v1879_v22, 0.0  ;;  %vm833_vm13 = vcmp.ge.f32.partialorder %v1881_v30, 0.0  ;;  %vm834_vm12 = vcmp.ge.f32.partialorder %v1883_v35, 0.0  ;;  %v849_v29 = vmul.f32 0.2, %v1849_v47 }
 0x1bf   : > { %v850_v12 = vmul.f32 0.2, %v1851_v50  ;;  %v851_v61 = vmul.f32 0.2, %v1853_v21  ;;  %vm835_vm1 = vcmp.ge.f32.partialorder %v1895_v55, 0.0  ;;  %vm836_vm0 = vcmp.ge.f32.partialorder %v1904_v51, 0.0 }
 0x1c0   : > { %v852_v18 = vmul.f32 0.2, %v1855_v62  ;;  %v853_v63 = vmul.f32 0.2, %v1857_v57  ;;  %v854_v33 = vmul.f32 0.2, %v1859_v25  ;;  %v872_v0 = vsel %vm808_vm3, %v1831_v7, %v840_v4 }
 0x1c1   : > { %v855_v38 = vmul.f32 0.2, %v1861_v24  ;;  %v856_v19 = vmul.f32 0.2, %v1863_v27  ;;  %v857_v3 = vmul.f32 0.2, %v1865_v2  ;;  %v873_v49 = vsel %vm809_vm4, %v1833_v53, %v841_v37 }
 0x1c2   : > { %v858_v31 = vmul.f32 0.2, %v1867_v5  ;;  %v859_v59 = vmul.f32 0.2, %v1869_v8  ;;  %v860_v10 = vmul.f32 0.2, %v1871_v11  ;;  %v874_v36 = vsel %vm810_vm5, %v1835_v23, %v842_v39 }
 0x1c3   : > { %v861_v16 = vmul.f32 0.2, %v1873_v14  ;;  %v862_v42 = vmul.f32 0.2, %v1875_v17  ;;  %v863_v43 = vmul.f32 0.2, %v1877_v20  ;;  %v875_v44 = vsel %vm811_vm6, %v1837_v40, %v843_v52 }
 0x1c4   : > { %v864_v46 = vmul.f32 0.2, %v1879_v22  ;;  %v865_v7 = vmul.f32 0.2, %v1881_v30  ;;  %v866_v53 = vmul.f32 0.2, %v1883_v35  ;;  %v876_v23 = vsel %vm812_vm7, %v1839_v45, %v844_v26 }
 0x1c5   : > { %v867_v60 = vmul.f32 0.2, %v1895_v55  ;;  %v868_v58 = vmul.f32 0.2, %v1904_v51  ;;  %v877_v32 = vsel %vm813_vm8, %v1841_v54, %v845_v56  ;;  %vm2086_vm2 = vcmp.ge.f32.partialorder %v1843_v48, 0.0 }
 0x1c6   : > { %v878_v40 = vsel %vm2086_vm2, %v1843_v48, %v846_v28  ;;  %vm2087_vm3 = vcmp.ge.f32.partialorder %v1845_v1, 0.0  ;;  %vm2088_vm4 = vcmp.ge.f32.partialorder %v1847_v41, 0.0  ;;  %vm2089_vm5 = vcmp.ge.f32.partialorder %v1849_v47, 0.0 }
 0x1c7   : > { %v879_v4 = vsel %vm2087_vm3, %v1845_v1, %v847_v6  ;;  %v880_v45 = vsel %vm2088_vm4, %v1847_v41, %v848_v13  ;;  %v881_v37 = vsel %vm2089_vm5, %v1849_v47, %v849_v29  ;;  %vm2090_vm6 = vcmp.ge.f32.partialorder %v1851_v50, 0.0 }
 0x1c8   : > { %v882_v54 = vsel %vm2090_vm6, %v1851_v50, %v850_v12  ;;  %vm2091_vm7 = vcmp.ge.f32.partialorder %v1853_v21, 0.0  ;;  %v884_v1 = vsel %vm820_vm15, %v1855_v62, %v852_v18  ;;  %v885_v41 = vsel %vm821_vm10, %v1857_v57, %v853_v63 }
 0x1c9   : > { %v883_v48 = vsel %vm2091_vm7, %v1853_v21, %v851_v61  ;;  %vm2092_vm8 = vcmp.ge.f32.partialorder %v1859_v25, 0.0  ;;  %vm2093_vm2 = vcmp.ge.f32.partialorder %v1861_v24, 0.0  ;;  %vm2094_vm3 = vcmp.ge.f32.partialorder %v1863_v27, 0.0 }
 0x1ca   : > { %v886_v47 = vsel %vm2092_vm8, %v1859_v25, %v854_v33  ;;  %v887_v50 = vsel %vm2093_vm2, %v1861_v24, %v855_v38  ;;  %v888_v21 = vsel %vm2094_vm3, %v1863_v27, %v856_v19  ;;  %vm2095_vm4 = vcmp.ge.f32.partialorder %v1865_v2, 0.0 }
 0x1cb   : > { %v889_v62 = vsel %vm2095_vm4, %v1865_v2, %v857_v3  ;;  %v890_v57 = vsel %vm826_vm14, %v1867_v5, %v858_v31  ;;  %vm2096_vm10 = vcmp.ge.f32.partialorder %v1869_v8, 0.0  ;;  %vm2097_vm15 = vcmp.ge.f32.partialorder %v1871_v11, 0.0 }
 0x1cc   : > { %v891_v25 = vsel %vm2096_vm10, %v1869_v8, %v859_v59  ;;  %v892_v24 = vsel %vm2097_vm15, %v1871_v11, %v860_v10  ;;  %vm2098_vm5 = vcmp.ge.f32.partialorder %v1873_v14, 0.0  ;;  %v894_v2 = vsel %vm830_vm9, %v1875_v17, %v862_v42 }
 0x1cd   : > { %v893_v27 = vsel %vm2098_vm5, %v1873_v14, %v861_v16  ;;  %vm2099_vm14 = vcmp.ge.f32.partialorder %v1877_v20, 0.0  ;;  %v896_v8 = vsel %vm832_vm11, %v1879_v22, %v864_v46  ;;  %v897_v11 = vsel %vm833_vm13, %v1881_v30, %v865_v7 }
 0x1ce   : > { %v895_v5 = vsel %vm2099_vm14, %v1877_v20, %v863_v43  ;;  %v898_v14 = vsel %vm834_vm12, %v1883_v35, %v866_v53  ;;  %v899_v17 = vsel %vm835_vm1, %v1895_v55, %v867_v60  ;;  %v900_v20 = vsel %vm836_vm0, %v1904_v51, %v868_v58 }
 0x1cf   : > { %v1222_v22 = vpack.c.bf16 %v1935_v9, %v1923_v34  ;;  %v1227_v30 = vpack.c.bf16 %v872_v0, %v871_v15  ;;  %v1232_v39 = vpack.c.bf16 %v874_v36, %v873_v49  ;;  %v1237_v52 = vpack.c.bf16 %v876_v23, %v875_v44 }
 0x1d0   : > { %v1242_v26 = vpack.c.bf16 %v878_v40, %v877_v32  ;;  %v1247_v35 = vpack.c.bf16 %v880_v45, %v879_v4  ;;  %v1252_v55 = vpack.c.bf16 %v882_v54, %v881_v37  ;;  %v1257_v56 = vpack.c.bf16 %v884_v1, %v883_v48 }
 0x1d1   : > { %1223 = vst [vmem:[%s2040_s19] sm:$0xff] %v1222_v22   ;;  %1299 = vst [vmem:[%s2040_s19 + $0x8] sm:$0xff] %v1227_v30   ;;  %v1262_v28 = vpack.c.bf16 %v886_v47, %v885_v41  ;;  %v1267_v51 = vpack.c.bf16 %v888_v21, %v887_v50  ;;  %v1272_v34 = vpack.c.bf16 %v890_v57, %v889_v62 }
 0x1d2   : > { %1300 = vst [vmem:[%s2040_s19 + $0x10] sm:$0xff] %v1232_v39   ;;  %1301 = vst [vmem:[%s2040_s19 + $0x18] sm:$0xff] %v1237_v52   ;;  %v1277_v6 = vpack.c.bf16 %v892_v24, %v891_v25  ;;  %v1282_v13 = vpack.c.bf16 %v894_v2, %v893_v27  ;;  %v1287_v9 = vpack.c.bf16 %v896_v8, %v895_v5 }
 0x1d3   : > { %1302 = vst [vmem:[%s2040_s19 + $0x20] sm:$0xff] %v1242_v26   ;;  %1303 = vst [vmem:[%s2040_s19 + $0x28] sm:$0xff] %v1247_v35   ;;  %v1292_v29 = vpack.c.bf16 %v898_v14, %v897_v11  ;;  %v1297_v12 = vpack.c.bf16 %v900_v20, %v899_v17 }
 0x1d4   : > { %1304 = vst [vmem:[%s2040_s19 + $0x30] sm:$0xff] %v1252_v55   ;;  %1305 = vst [vmem:[%s2040_s19 + $0x38] sm:$0xff] %v1257_v56  }
 0x1d5   : > { %1306 = vst [vmem:[%s2040_s19 + $0x40] sm:$0xff] %v1262_v28   ;;  %1307 = vst [vmem:[%s2040_s19 + $0x48] sm:$0xff] %v1267_v51  }
 0x1d6   : > { %1308 = vst [vmem:[%s2040_s19 + $0x50] sm:$0xff] %v1272_v34   ;;  %1309 = vst [vmem:[%s2040_s19 + $0x58] sm:$0xff] %v1277_v6  }
 0x1d7   : > { %1310 = vst [vmem:[%s2040_s19 + $0x60] sm:$0xff] %v1282_v13   ;;  %1311 = vst [vmem:[%s2040_s19 + $0x68] sm:$0xff] %v1287_v9  }
 0x1d8   : > { %1312 = vst [vmem:[%s2040_s19 + $0x70] sm:$0xff] %v1292_v29   ;;  %1313 = vst [vmem:[%s2040_s19 + $0x78] sm:$0xff] %v1297_v12  }
 0x1d9 PF: > { %s14_s15 = sadd.s32 1, %s1442_s15  }
 0x1da   : > { %p11_p4 = scmp.ge.s32.totalorder %s14_s15, 4  }
 0x1dc   :  { %13 = sbr.rel (!%p11_p4) target bundleno = 1 (0x1), region = 66 }

// kernel: _lambda_.7
= control target key start
LH: loop header
LB: loop body
LE: loop exit
PB: predicated region body
PF: predicated region fallthrough
CT: control target
= control target key end

     0   :  { %s849_s15 = smov 0   ;;  %s942_s0 = inlined_call_operand.vmem [shape: bf16[2,64,256], index: 0, kind: input, shape index: {}]   ;;  %s943_s1 = inlined_call_operand.vmem [shape: bf16[256,128], index: 1, kind: input, shape index: {}]   ;;  %s944_s2 = inlined_call_operand.vmem [shape: f32[1,128], index: 2, kind: input, shape index: {}]   ;;  %s945_s3 = inlined_call_operand.vmem [shape: f32[1,128], index: 3, kind: input, shape index: {}]   ;;  %s946_s4 = inlined_call_operand.vmem [shape: bf16[2,64,128], index: 4, kind: output, shape index: {}]  }
   0x1 LB: > { %s644_s16 = sadd.s32 4294967295, %s822_s15   ;;  %p648_p0 = scmp.ge.s32.totalorder %s822_s15, 1  ;;  %s822_s15 = sphi %s849_s15, %s14_s15  }
   0x2   : > { %p162_p1 = scmp.lt.s32.totalorder %s822_s15, 3 }
   0x4   : > { %p163_p2 = pnand %p648_p0, %p162_p1 }
   0x5   : > { %p188_p3 = scmp.lt.s32.totalorder (!%p163_p2), %s644_s16, 1 }
   0x6   : > { %166 = sbr.rel (%p163_p2) target bundleno = 341 (0x155), region = 36 }
   0xb   : > { %v786_v0 = vld [vmem:[%s943_s1 + $0x78] sm:$0xff]   ;;  %v788_v2 = vld [vmem:[%s943_s1 + $0x70] sm:$0xff]   ;;  %v790_v4 = vld [vmem:[%s943_s1 + $0x68] sm:$0xff]   ;;  %s948_s16 = smov (!%p188_p3, %s644_s16), 1 }
   0xc   : > { %v787_v1 = vld [vmem:[%s943_s1 + $0x38] sm:$0xff]   ;;  %722 = vmatprep.subr.bf16.mxu0 %v786_v0  ;;  %762 = vmatprep.subr.bf16.mxu1 %v786_v0  ;;  %v789_v3 = vld [vmem:[%s943_s1 + $0x30] sm:$0xff]   ;;  %v791_v5 = vld [vmem:[%s943_s1 + $0x28] sm:$0xff]   ;;  %s689_s7 = sshll.u32 %s948_s16, 6 }
   0xd   : > { %723 = vmatpush3.bf16.msra.mxu0 %v787_v1  ;;  %770 = vmatpush3.bf16.msra.mxu1 %v787_v1  ;;  %v792_v6 = vld [vmem:[%s943_s1 + $0x60] sm:$0xff]   ;;  %v794_v8 = vld [vmem:[%s943_s1 + $0x58] sm:$0xff]   ;;  %s890_s12 = scalar_lea.vmem %s942_s0, %s689_s7  ;;  %v796_v10 = vld [vmem:[%s943_s1 + $0x50] sm:$0xff]   ;;  %s690_s7 = sshll.u32 %s948_s16, 5 }
   0xe   : > { %724 = vmatprep.subr.bf16.mxu0 %v788_v2  ;;  %763 = vmatprep.subr.bf16.mxu1 %v788_v2  ;;  %v793_v7 = vld [vmem:[%s943_s1 + $0x20] sm:$0xff]   ;;  %v795_v9 = vld [vmem:[%s943_s1 + $0x18] sm:$0xff]   ;;  %v797_v13 = vld [vmem:[%s943_s1 + $0x10] sm:$0xff]   ;;  %s197_s16 = scalar_lea.vmem %s946_s4, %s690_s7 }
   0xf   : > { %v804_v11 = vld [vmem:[%s890_s12 + $0x4] ss:$8 sps:$4 sm:$0xff]   ;;  %v802_v18 = vld [vmem:[%s890_s12] ss:$8 sps:$4 sm:$0xff]   ;;  %v808_v20 = vld [vmem:[%s890_s12 + $0x14] ss:$8 sps:$4 sm:$0xff]  }
  0x10   : > { %v807_v12 = vld [vmem:[%s890_s12 + $0x24] ss:$8 sps:$4 sm:$0xff]   ;;  %407 = vmatprep.mubr.bf16.mxu0 %v804_v11  ;;  %v805_v19 = vld [vmem:[%s890_s12 + $0x20] ss:$8 sps:$4 sm:$0xff]   ;;  %v811_v21 = vld [vmem:[%s890_s12 + $0x34] ss:$8 sps:$4 sm:$0xff]  }
  0x11   : > { %725 = vmatpush3.bf16.msra.mxu0 %v789_v3  ;;  %771 = vmatpush3.bf16.msra.mxu1 %v789_v3  ;;  %v798_v14 = vld [vmem:[%s943_s1 + $0x48] sm:$0xff]   ;;  %v800_v16 = vld [vmem:[%s943_s1 + $0x40] sm:$0xff]   ;;  %v810_v22 = vld [vmem:[%s890_s12 + $0x10] ss:$8 sps:$4 sm:$0xff]  }
  0x12   : > { %726 = vmatprep.subr.bf16.mxu0 %v790_v4  ;;  %764 = vmatprep.subr.bf16.mxu1 %v790_v4  ;;  %v799_v15 = vld [vmem:[%s943_s1 + $0x8] sm:$0xff]   ;;  %v801_v17 = vld [vmem:[%s943_s1] sm:$0xff]   ;;  %v813_v23 = vld [vmem:[%s890_s12 + $0x30] ss:$8 sps:$4 sm:$0xff]  }
  0x13   : > { %423 = vmatprep.mubr.bf16.mxu1 %v807_v12 }
  0x15   : > { %727 = vmatpush3.bf16.msra.mxu0 %v791_v5  ;;  %772 = vmatpush3.bf16.msra.mxu1 %v791_v5 }
  0x16   : > { %728 = vmatprep.subr.bf16.mxu0 %v792_v6  ;;  %765 = vmatprep.subr.bf16.mxu1 %v792_v6 }
  0x19   : > { %729 = vmatpush3.bf16.msra.mxu0 %v793_v7  ;;  %773 = vmatpush3.bf16.msra.mxu1 %v793_v7 }
  0x1a   : > { %730 = vmatprep.subr.bf16.mxu0 %v794_v8  ;;  %766 = vmatprep.subr.bf16.mxu1 %v794_v8 }
  0x1d   : > { %731 = vmatpush3.bf16.msra.mxu0 %v795_v9  ;;  %774 = vmatpush3.bf16.msra.mxu1 %v795_v9 }
  0x1e   : > { %732 = vmatprep.subr.bf16.mxu0 %v796_v10  ;;  %767 = vmatprep.subr.bf16.mxu1 %v796_v10 }
  0x21   : > { %733 = vmatpush3.bf16.msra.mxu0 %v797_v13  ;;  %775 = vmatpush3.bf16.msra.mxu1 %v797_v13 }
  0x22   : > { %734 = vmatprep.subr.bf16.mxu0 %v798_v14  ;;  %768 = vmatprep.subr.bf16.mxu1 %v798_v14 }
  0x25   : > { %735 = vmatpush3.bf16.msra.mxu0 %v799_v15  ;;  %776 = vmatpush3.bf16.msra.mxu1 %v799_v15 }
  0x26   : > { %736 = vmatprep.subr.bf16.mxu0 %v800_v16  ;;  %769 = vmatprep.subr.bf16.mxu1 %v800_v16 }
  0x29   : > { %737 = vmatpush3.bf16.msra.mxu0 %v801_v17  ;;  %777 = vmatpush3.bf16.msra.mxu1 %v801_v17 }
  0x2c   : > { %408 = vmatmul.mubr.bf16.vlgmr.msra.gmra.mxu0 %v802_v18  ;;  %424 = vmatmul.mubr.bf16.vlgmr.msra.gmra.mxu1 %v805_v19 }
  0x2d   : > { %415 = vmatprep.mubr.bf16.mxu0 %v808_v20  ;;  %431 = vmatprep.mubr.bf16.mxu1 %v811_v21 }
  0x34   : > { %416 = vmatmul.mubr.bf16.gmra.mxu0 %v810_v22  ;;  %432 = vmatmul.mubr.bf16.gmra.mxu1 %v813_v23 }
  0xec   : > { %v738_v24 = vpop.f32.mrf.mxu0  ;;  %v750_v25 = vpop.f32.mrf.mxu1 }
  0xee   : > { %v739_v26 = vpop.f32.mrf.mxu0  ;;  %v751_v27 = vpop.f32.mrf.mxu1 }
  0xef   : > { %v740_v36 = vadd.f32 %v739_v26, %v738_v24  ;;  %v752_v45 = vadd.f32 %v751_v27, %v750_v25 }
  0xf0   : > { %v741_v28 = vpop.f32.mrf.mxu0  ;;  %v753_v29 = vpop.f32.mrf.mxu1 }
  0xf2   : > { %v742_v30 = vpop.f32.mrf.mxu0  ;;  %v754_v31 = vpop.f32.mrf.mxu1 }
  0xf3   : > { %v743_v34 = vadd.f32 %v742_v30, %v741_v28  ;;  %v755_v47 = vadd.f32 %v754_v31, %v753_v29  ;;  %v677_v30 = vld [vmem:[%s944_s2] ss:$0 sm:$0xff] }
  0xf4   : > { %v744_v32 = vpop.f32.mrf.mxu0  ;;  %v756_v33 = vpop.f32.mrf.mxu1 }
  0xf5   : > { %v440_v40 = vadd.f32 %v743_v34, %v740_v36 }
  0xf6   : > { %v745_v35 = vpop.f32.mrf.mxu0  ;;  %v757_v39 = vpop.f32.mrf.mxu1 }
  0xf7   : > { %v746_v37 = vadd.f32 %v745_v35, %v744_v32  ;;  %v758_v50 = vadd.f32 %v757_v39, %v756_v33  ;;  %v678_v39 = vld [vmem:[%s945_s3] ss:$0 sm:$0xff] }
  0xf8   : > { %v747_v38 = vpop.f32.mrf.mxu0  ;;  %v759_v44 = vpop.f32.mrf.mxu1 }
  0xf9   : > { %v441_v42 = vadd.f32 %v746_v37, %v440_v40 }
  0xfa   : > { %v748_v41 = vpop.f32.mrf.mxu0  ;;  %v760_v49 = vpop.f32.mrf.mxu1 }
  0xfb   : > { %v749_v43 = vadd.f32 %v748_v41, %v747_v38  ;;  %v761_v52 = vadd.f32 %v760_v49, %v759_v44 }
  0xfd   : > { %v442_v46 = vadd.f32 %v749_v43, %v441_v42 }
  0xff   : > { %v443_v48 = vadd.f32 %v752_v45, %v442_v46 }
 0x101   : > { %v444_v51 = vadd.f32 %v755_v47, %v443_v48 }
 0x103   : > { %v445_v53 = vadd.f32 %v758_v50, %v444_v51 }
 0x105   : > { %v446_v54 = vadd.f32 %v761_v52, %v445_v53 }
 0x107   : > { %v447_v55 = vrot.slane %v446_v54, 4 }
 0x109   : > { %v448_v56 = vadd.f32 %v447_v55, %v446_v54 }
 0x10b   : > { %v449_v57 = vrot.slane %v448_v56, 2 }
 0x10d   : > { %v450_v58 = vadd.f32 %v449_v57, %v448_v56 }
 0x10f   : > { %v451_v59 = vrot.slane %v450_v58, 1 }
 0x111   : > { %v452_v60 = vadd.f32 %v451_v59, %v450_v58 }
 0x113   : > { %v454_v61 = vmul.f32 0.015625, %v452_v60 }
 0x115   : > { %v455_v62 = vsub.f32 %v740_v36, %v454_v61  ;;  %v456_v63 = vsub.f32 %v743_v34, %v454_v61  ;;  %v457_v0 = vsub.f32 %v746_v37, %v454_v61  ;;  %v458_v1 = vsub.f32 %v749_v43, %v454_v61 }
 0x116   : > { %v459_v4 = vsub.f32 %v752_v45, %v454_v61  ;;  %v460_v7 = vsub.f32 %v755_v47, %v454_v61  ;;  %v461_v10 = vsub.f32 %v758_v50, %v454_v61  ;;  %v462_v13 = vsub.f32 %v761_v52, %v454_v61 }
 0x117   : > { %v463_v2 = vmul.f32 %v455_v62, %v455_v62  ;;  %v464_v3 = vmul.f32 %v456_v63, %v456_v63  ;;  %v465_v5 = vmul.f32 %v457_v0, %v457_v0  ;;  %v466_v8 = vmul.f32 %v458_v1, %v458_v1 }
 0x118   : > { %v467_v11 = vmul.f32 %v459_v4, %v459_v4  ;;  %v468_v14 = vmul.f32 %v460_v7, %v460_v7  ;;  %v469_v16 = vmul.f32 %v461_v10, %v461_v10  ;;  %v470_v18 = vmul.f32 %v462_v13, %v462_v13 }
 0x119   : > { %v471_v6 = vadd.f32 %v464_v3, %v463_v2 }
 0x11b   : > { %v472_v9 = vadd.f32 %v471_v6, %v465_v5 }
 0x11d   : > { %v473_v12 = vadd.f32 %v472_v9, %v466_v8 }
 0x11f   : > { %v474_v15 = vadd.f32 %v473_v12, %v467_v11 }
 0x121   : > { %v475_v17 = vadd.f32 %v474_v15, %v468_v14 }
 0x123   : > { %v476_v19 = vadd.f32 %v475_v17, %v469_v16 }
 0x125   : > { %v477_v20 = vadd.f32 %v476_v19, %v470_v18 }
 0x127   : > { %v478_v21 = vrot.slane %v477_v20, 4 }
 0x129   : > { %v479_v22 = vadd.f32 %v478_v21, %v477_v20 }
 0x12b   : > { %v480_v23 = vrot.slane %v479_v22, 2 }
 0x12d   : > { %v481_v24 = vadd.f32 %v480_v23, %v479_v22 }
 0x12f   : > { %v482_v25 = vrot.slane %v481_v24, 1 }
 0x131   : > { %v483_v26 = vadd.f32 %v482_v25, %v481_v24 }
 0x133   : > { %v484_v27 = vmul.f32 0.015625, %v483_v26 }
 0x135   : > { %v485_v28 = vadd.f32 1e-05, %v484_v27 }
 0x137   : > { %814 = vrsqrt.f32 %v485_v28 }
 0x144   : > { %v815_v29 = vpop.eup %814 }
 0x145   : > { %v487_v31 = vmul.f32 %v815_v29, %v455_v62  ;;  %v488_v32 = vmul.f32 %v815_v29, %v456_v63  ;;  %v489_v33 = vmul.f32 %v815_v29, %v457_v0  ;;  %v490_v34 = vmul.f32 %v815_v29, %v458_v1 }
 0x146   : > { %v491_v35 = vmul.f32 %v815_v29, %v459_v4  ;;  %v492_v36 = vmul.f32 %v815_v29, %v460_v7  ;;  %v493_v37 = vmul.f32 %v815_v29, %v461_v10  ;;  %v494_v38 = vmul.f32 %v815_v29, %v462_v13 }
 0x147   : > { %v502_v40 = vmul.f32 %v677_v30, %v487_v31  ;;  %v503_v41 = vmul.f32 %v677_v30, %v488_v32  ;;  %v504_v42 = vmul.f32 %v677_v30, %v489_v33  ;;  %v505_v43 = vmul.f32 %v677_v30, %v490_v34 }
 0x148   : > { %v506_v44 = vmul.f32 %v677_v30, %v491_v35  ;;  %v507_v45 = vmul.f32 %v677_v30, %v492_v36  ;;  %v508_v46 = vmul.f32 %v677_v30, %v493_v37  ;;  %v509_v47 = vmul.f32 %v677_v30, %v494_v38 }
 0x149   : > { %v517_v48 = vadd.f32 %v678_v39, %v502_v40  ;;  %v518_v49 = vadd.f32 %v678_v39, %v503_v41  ;;  %v519_v50 = vadd.f32 %v678_v39, %v504_v42  ;;  %v520_v51 = vadd.f32 %v678_v39, %v505_v43 }
 0x14a   : > { %v521_v52 = vadd.f32 %v678_v39, %v506_v44  ;;  %v522_v53 = vadd.f32 %v678_v39, %v507_v45  ;;  %v523_v54 = vadd.f32 %v678_v39, %v508_v46  ;;  %v524_v55 = vadd.f32 %v678_v39, %v509_v47 }
 0x14b   : > { %vm525_vm0 = vcmp.ge.f32.partialorder %v517_v48, 0.0  ;;  %vm526_vm1 = vcmp.ge.f32.partialorder %v518_v49, 0.0  ;;  %vm527_vm2 = vcmp.ge.f32.partialorder %v519_v50, 0.0  ;;  %vm528_vm3 = vcmp.ge.f32.partialorder %v520_v51, 0.0 }
 0x14c   : > { %vm529_vm4 = vcmp.ge.f32.partialorder %v521_v52, 0.0  ;;  %vm530_vm5 = vcmp.ge.f32.partialorder %v522_v53, 0.0  ;;  %vm531_vm6 = vcmp.ge.f32.partialorder %v523_v54, 0.0  ;;  %vm532_vm7 = vcmp.ge.f32.partialorder %v524_v55, 0.0 }
 0x14d   : > { %v533_v56 = vmul.f32 0.2, %v517_v48  ;;  %v534_v57 = vmul.f32 0.2, %v518_v49  ;;  %v535_v58 = vmul.f32 0.2, %v519_v50 }
 0x14e   : > { %v536_v59 = vmul.f32 0.2, %v520_v51  ;;  %v537_v60 = vmul.f32 0.2, %v521_v52  ;;  %v538_v61 = vmul.f32 0.2, %v522_v53 }
 0x14f   : > { %v539_v62 = vmul.f32 0.2, %v523_v54  ;;  %v540_v63 = vmul.f32 0.2, %v524_v55  ;;  %v541_v0 = vsel %vm525_vm0, %v517_v48, %v533_v56  ;;  %v542_v1 = vsel %vm526_vm1, %v518_v49, %v534_v57 }
 0x150   : > { %v543_v2 = vsel %vm527_vm2, %v519_v50, %v535_v58  ;;  %v544_v3 = vsel %vm528_vm3, %v520_v51, %v536_v59  ;;  %v545_v4 = vsel %vm529_vm4, %v521_v52, %v537_v60  ;;  %v546_v5 = vsel %vm530_vm5, %v522_v53, %v538_v61 }
 0x151   : > { %v547_v6 = vsel %vm531_vm6, %v523_v54, %v539_v62  ;;  %v548_v7 = vsel %vm532_vm7, %v524_v55, %v540_v63  ;;  %v702_v8 = vpack.c.bf16 %v542_v1, %v541_v0  ;;  %v707_v9 = vpack.c.bf16 %v544_v3, %v543_v2 }
 0x152   : > { %v712_v10 = vpack.c.bf16 %v546_v5, %v545_v4  ;;  %v717_v11 = vpack.c.bf16 %v548_v7, %v547_v6 }
 0x153   : > { %703 = vst [vmem:[%s197_s16] sm:$0xff] %v702_v8   ;;  %719 = vst [vmem:[%s197_s16 + $0x8] sm:$0xff] %v707_v9  }
 0x154   : > { %720 = vst [vmem:[%s197_s16 + $0x10] sm:$0xff] %v712_v10   ;;  %721 = vst [vmem:[%s197_s16 + $0x18] sm:$0xff] %v717_v11  }
 0x155 PF: > { %s14_s15 = sadd.s32 1, %s822_s15  }
 0x156   : > { %p11_p4 = scmp.ge.s32.totalorder %s14_s15, 4  }
 0x158   :  { %13 = sbr.rel (!%p11_p4) target bundleno = 1 (0x1), region = 66 }

// kernel: _lambda_.8
= control target key start
LH: loop header
LB: loop body
LE: loop exit
PB: predicated region body
PF: predicated region fallthrough
CT: control target
= control target key end

     0   :  { %s860_s15 = smov 0   ;;  %s987_s0 = inlined_call_operand.vmem [shape: bf16[2,16,512], index: 0, kind: input, shape index: {}]   ;;  %s988_s1 = inlined_call_operand.vmem [shape: bf16[512,128], index: 1, kind: input, shape index: {}]   ;;  %s989_s2 = inlined_call_operand.vmem [shape: f32[1,128], index: 2, kind: input, shape index: {}]   ;;  %s990_s3 = inlined_call_operand.vmem [shape: f32[1,128], index: 3, kind: input, shape index: {}]   ;;  %s991_s4 = inlined_call_operand.vmem [shape: bf16[2,16,128], index: 4, kind: output, shape index: {}]  }
   0x1 LB: > { %s675_s16 = sadd.s32 4294967295, %s833_s15   ;;  %p679_p0 = scmp.ge.s32.totalorder %s833_s15, 1  ;;  %s833_s15 = sphi %s860_s15, %s14_s15  }
   0x2   : > { %p162_p1 = scmp.lt.s32.totalorder %s833_s15, 3 }
   0x4   : > { %p163_p2 = pnand %p679_p0, %p162_p1 }
   0x5   : > { %p188_p3 = scmp.lt.s32.totalorder (!%p163_p2), %s675_s16, 1 }
   0x6   : > { %166 = sbr.rel (%p163_p2) target bundleno = 313 (0x139), region = 36 }
   0xb   : > { %v787_v0 = vld [vmem:[%s988_s1 + $0x78] sm:$0xff]   ;;  %v791_v4 = vld [vmem:[%s988_s1 + $0x70] sm:$0xff]   ;;  %v795_v8 = vld [vmem:[%s988_s1 + $0x68] sm:$0xff]   ;;  %s993_s16 = smov (!%p188_p3, %s675_s16), 1 }
   0xc   : > { %v788_v1 = vld [vmem:[%s988_s1 + $0xf8] sm:$0xff]   ;;  %735 = vmatprep.subr.bf16.mxu0 %v787_v0  ;;  %v792_v5 = vld [vmem:[%s988_s1 + $0xf0] sm:$0xff]   ;;  %v796_v9 = vld [vmem:[%s988_s1 + $0xe8] sm:$0xff]   ;;  %s726_s23 = sshll.u32 %s993_s16, 5  ;;  %s727_s17 = sshll.u32 %s993_s16, 3 }
   0xd   : > { %v789_v2 = vld [vmem:[%s988_s1 + $0x38] sm:$0xff]   ;;  %757 = vmatprep.subr.bf16.mxu1 %v788_v1  ;;  %v793_v6 = vld [vmem:[%s988_s1 + $0x30] sm:$0xff]   ;;  %v797_v10 = vld [vmem:[%s988_s1 + $0x28] sm:$0xff]   ;;  %s192_s6 = scalar_lea.vmem %s987_s0, %s726_s23  ;;  %s197_s20 = scalar_lea.vmem %s991_s4, %s727_s17 }
   0xe   : > { %v790_v3 = vld [vmem:[%s988_s1 + $0xb8] sm:$0xff]   ;;  %736 = vmatpush3.bf16.msra.mxu0 %v789_v2  ;;  %v794_v7 = vld [vmem:[%s988_s1 + $0xb0] sm:$0xff]   ;;  %v798_v11 = vld [vmem:[%s988_s1 + $0xa8] sm:$0xff]  }
   0xf   : > { %758 = vmatpush3.bf16.msra.mxu1 %v790_v3  ;;  %737 = vmatprep.subr.bf16.mxu0 %v791_v4  ;;  %v799_v12 = vld [vmem:[%s988_s1 + $0x60] sm:$0xff]   ;;  %v803_v16 = vld [vmem:[%s988_s1 + $0x58] sm:$0xff]   ;;  %v807_v20 = vld [vmem:[%s988_s1 + $0x50] sm:$0xff]  }
  0x10   : > { %759 = vmatprep.subr.bf16.mxu1 %v792_v5  ;;  %v800_v13 = vld [vmem:[%s988_s1 + $0xe0] sm:$0xff]   ;;  %v804_v17 = vld [vmem:[%s988_s1 + $0xd8] sm:$0xff]   ;;  %v808_v21 = vld [vmem:[%s988_s1 + $0xd0] sm:$0xff]  }
  0x11   : > { %v801_v14 = vld [vmem:[%s988_s1 + $0x20] sm:$0xff]   ;;  %v805_v18 = vld [vmem:[%s988_s1 + $0x18] sm:$0xff]   ;;  %v809_v22 = vld [vmem:[%s988_s1 + $0x10] sm:$0xff]  }
  0x12   : > { %738 = vmatpush3.bf16.msra.mxu0 %v793_v6  ;;  %v802_v15 = vld [vmem:[%s988_s1 + $0xa0] sm:$0xff]   ;;  %v806_v19 = vld [vmem:[%s988_s1 + $0x98] sm:$0xff]   ;;  %v810_v23 = vld [vmem:[%s988_s1 + $0x90] sm:$0xff]  }
  0x13   : > { %760 = vmatpush3.bf16.msra.mxu1 %v794_v7  ;;  %739 = vmatprep.subr.bf16.mxu0 %v795_v8  ;;  %v811_v24 = vld [vmem:[%s988_s1 + $0x48] sm:$0xff]   ;;  %v815_v28 = vld [vmem:[%s988_s1 + $0x40] sm:$0xff]  }
  0x14   : > { %761 = vmatprep.subr.bf16.mxu1 %v796_v9  ;;  %v812_v25 = vld [vmem:[%s988_s1 + $0xc8] sm:$0xff]   ;;  %v816_v29 = vld [vmem:[%s988_s1 + $0xc0] sm:$0xff]  }
  0x15   : > { %v813_v26 = vld [vmem:[%s988_s1 + $0x8] sm:$0xff]   ;;  %v817_v30 = vld [vmem:[%s988_s1] sm:$0xff]  }
  0x16   : > { %740 = vmatpush3.bf16.msra.mxu0 %v797_v10  ;;  %v814_v27 = vld [vmem:[%s988_s1 + $0x88] sm:$0xff]   ;;  %v818_v31 = vld [vmem:[%s988_s1 + $0x80] sm:$0xff]  }
  0x17   : > { %762 = vmatpush3.bf16.msra.mxu1 %v798_v11  ;;  %741 = vmatprep.subr.bf16.mxu0 %v799_v12  ;;  %v819_v32 = vld [vmem:[%s192_s6] ss:$16 sps:$4 sm:$0xff]   ;;  %v821_v33 = vld [vmem:[%s192_s6 + $0x4] ss:$16 sps:$4 sm:$0xff]   ;;  %v822_v34 = vld [vmem:[%s192_s6 + $0x8] ss:$16 sps:$4 sm:$0xff]  }
  0x18   : > { %763 = vmatprep.subr.bf16.mxu1 %v800_v13  ;;  %v824_v35 = vld [vmem:[%s192_s6 + $0xc] ss:$16 sps:$4 sm:$0xff]   ;;  %511 = vmatprep.mubr.bf16.mxu0 %v821_v33  ;;  %v720_v8 = vld [vmem:[%s989_s2] ss:$0 sm:$0xff] }
  0x19   : > { %552 = vmatprep.mubr.bf16.mxu1 %v824_v35  ;;  %v721_v11 = vld [vmem:[%s990_s3] ss:$0 sm:$0xff] }
  0x1a   : > { %742 = vmatpush3.bf16.msra.mxu0 %v801_v14 }
  0x1b   : > { %764 = vmatpush3.bf16.msra.mxu1 %v802_v15  ;;  %743 = vmatprep.subr.bf16.mxu0 %v803_v16 }
  0x1c   : > { %765 = vmatprep.subr.bf16.mxu1 %v804_v17 }
  0x1e   : > { %744 = vmatpush3.bf16.msra.mxu0 %v805_v18 }
  0x1f   : > { %766 = vmatpush3.bf16.msra.mxu1 %v806_v19  ;;  %745 = vmatprep.subr.bf16.mxu0 %v807_v20 }
  0x20   : > { %767 = vmatprep.subr.bf16.mxu1 %v808_v21 }
  0x22   : > { %746 = vmatpush3.bf16.msra.mxu0 %v809_v22 }
  0x23   : > { %768 = vmatpush3.bf16.msra.mxu1 %v810_v23  ;;  %747 = vmatprep.subr.bf16.mxu0 %v811_v24 }
  0x24   : > { %769 = vmatprep.subr.bf16.mxu1 %v812_v25 }
  0x26   : > { %748 = vmatpush3.bf16.msra.mxu0 %v813_v26 }
  0x27   : > { %770 = vmatpush3.bf16.msra.mxu1 %v814_v27  ;;  %749 = vmatprep.subr.bf16.mxu0 %v815_v28 }
  0x28   : > { %771 = vmatprep.subr.bf16.mxu1 %v816_v29 }
  0x2a   : > { %750 = vmatpush3.bf16.msra.mxu0 %v817_v30 }
  0x2b   : > { %772 = vmatpush3.bf16.msra.mxu1 %v818_v31 }
  0x2d   : > { %512 = vmatmul.mubr.bf16.vlgmr.msra.gmra.mxu0 %v819_v32 }
  0x2e   : > { %553 = vmatmul.mubr.bf16.vlgmr.msra.gmra.mxu1 %v822_v34 }
  0xed   : > { %v751_v36 = vpop.f32.mrf.mxu0 }
  0xee   : > { %v773_v37 = vpop.f32.mrf.mxu1 }
  0xef   : > { %v752_v38 = vpop.f32.mrf.mxu0 }
  0xf0   : > { %v774_v39 = vpop.f32.mrf.mxu1  ;;  %v753_v42 = vadd.f32 %v752_v38, %v751_v36 }
  0xf1   : > { %v754_v40 = vpop.f32.mrf.mxu0  ;;  %v775_v43 = vadd.f32 %v774_v39, %v773_v37 }
  0xf2   : > { %v776_v41 = vpop.f32.mrf.mxu1 }
  0xf3   : > { %v755_v44 = vpop.f32.mrf.mxu0  ;;  %v555_v48 = vadd.f32 %v775_v43, %v753_v42 }
  0xf4   : > { %v756_v45 = vadd.f32 %v755_v44, %v754_v40  ;;  %v777_v46 = vpop.f32.mrf.mxu1 }
  0xf5   : > { %v778_v47 = vadd.f32 %v777_v46, %v776_v41 }
  0xf7   : > { %v558_v49 = vadd.f32 %v778_v47, %v756_v45 }
  0xf9   : > { %v561_v50 = vadd.f32 %v558_v49, %v555_v48 }
  0xfb   : > { %v562_v51 = vrot.slane %v561_v50, 4 }
  0xfd   : > { %v563_v52 = vadd.f32 %v562_v51, %v561_v50 }
  0xff   : > { %v564_v53 = vrot.slane %v563_v52, 2 }
 0x101   : > { %v565_v54 = vadd.f32 %v564_v53, %v563_v52 }
 0x103   : > { %v566_v55 = vrot.slane %v565_v54, 1 }
 0x105   : > { %v567_v56 = vadd.f32 %v566_v55, %v565_v54 }
 0x107   : > { %v569_v57 = vmul.f32 0.0625, %v567_v56 }
 0x109   : > { %v570_v58 = vsub.f32 %v555_v48, %v569_v57  ;;  %v571_v59 = vsub.f32 %v558_v49, %v569_v57 }
 0x10b   : > { %v572_v60 = vmul.f32 %v570_v58, %v570_v58  ;;  %v573_v61 = vmul.f32 %v571_v59, %v571_v59 }
 0x10d   : > { %v574_v62 = vadd.f32 %v573_v61, %v572_v60 }
 0x10f   : > { %v575_v63 = vrot.slane %v574_v62, 4 }
 0x111   : > { %v576_v0 = vadd.f32 %v575_v63, %v574_v62 }
 0x113   : > { %v577_v1 = vrot.slane %v576_v0, 2 }
 0x115   : > { %v578_v2 = vadd.f32 %v577_v1, %v576_v0 }
 0x117   : > { %v579_v3 = vrot.slane %v578_v2, 1 }
 0x119   : > { %v580_v4 = vadd.f32 %v579_v3, %v578_v2 }
 0x11b   : > { %v581_v5 = vmul.f32 0.0625, %v580_v4 }
 0x11d   : > { %v582_v6 = vadd.f32 1e-05, %v581_v5 }
 0x11f   : > { %825 = vrsqrt.f32 %v582_v6 }
 0x12c   : > { %v826_v7 = vpop.eup %825 }
 0x12d   : > { %v584_v9 = vmul.f32 %v826_v7, %v570_v58  ;;  %v585_v10 = vmul.f32 %v826_v7, %v571_v59 }
 0x12f   : > { %v593_v12 = vmul.f32 %v720_v8, %v584_v9  ;;  %v594_v13 = vmul.f32 %v720_v8, %v585_v10 }
 0x131   : > { %v602_v14 = vadd.f32 %v721_v11, %v593_v12  ;;  %v603_v15 = vadd.f32 %v721_v11, %v594_v13 }
 0x133   : > { %vm604_vm0 = vcmp.ge.f32.partialorder %v602_v14, 0.0  ;;  %vm605_vm1 = vcmp.ge.f32.partialorder %v603_v15, 0.0  ;;  %v606_v16 = vmul.f32 0.2, %v602_v14  ;;  %v607_v17 = vmul.f32 0.2, %v603_v15 }
 0x135   : > { %v608_v18 = vsel %vm604_vm0, %v602_v14, %v606_v16  ;;  %v609_v19 = vsel %vm605_vm1, %v603_v15, %v607_v17 }
 0x136   : > { %v733_v20 = vpack.c.bf16 %v609_v19, %v608_v18 }
 0x138   : > { %734 = vst [vmem:[%s197_s20] sm:$0xff] %v733_v20  }
 0x139 PF: > { %s14_s15 = sadd.s32 1, %s833_s15  }
 0x13a   : > { %p11_p4 = scmp.ge.s32.totalorder %s14_s15, 4  }
 0x13c   :  { %13 = sbr.rel (!%p11_p4) target bundleno = 1 (0x1), region = 66 }

// kernel: _lambda_.9
= control target key start
LH: loop header
LB: loop body
LE: loop exit
PB: predicated region body
PF: predicated region fallthrough
CT: control target
= control target key end

     0   :  { %v977_v22 = vmov 1966171168   ;;  %v156_v24 = vlaneseq  ;;  %s1212_s1 = inlined_call_operand.vmem [shape: bf16[1024,128], index: 1, kind: input, shape index: {}]   ;;  %s1213_s0 = inlined_call_operand.vmem [shape: bf16[2,1024], index: 0, kind: input, shape index: {}]   ;;  %s1214_s2 = inlined_call_operand.vmem [shape: f32[1,128], index: 2, kind: input, shape index: {}]   ;;  %s1215_s3 = inlined_call_operand.vmem [shape: f32[2,128], index: 3, kind: output, shape index: {}]  }
   0x1   :  { %v912_v0 = vld [vmem:[%s1212_s1 + $0x78] sm:$0xff]   ;;  %v916_v4 = vld [vmem:[%s1212_s1 + $0x70] sm:$0xff]   ;;  %v920_v8 = vld [vmem:[%s1212_s1 + $0x68] sm:$0xff]   ;;  %v154_v23 = vunpack.c.l.s4 %v977_v22 }
   0x2   :  { %v913_v1 = vld [vmem:[%s1212_s1 + $0xf8] sm:$0xff]   ;;  %823 = vmatprep.subr.bf16.mxu0 %v912_v0  ;;  %v917_v5 = vld [vmem:[%s1212_s1 + $0xf0] sm:$0xff]   ;;  %v921_v9 = vld [vmem:[%s1212_s1 + $0xe8] sm:$0xff]   ;;  %v157_v30 = vshrl.u32 %v156_v24, 7 }
   0x3   :  { %v914_v2 = vld [vmem:[%s1212_s1 + $0x38] sm:$0xff]   ;;  %845 = vmatprep.subr.bf16.mxu1 %v913_v1  ;;  %v918_v6 = vld [vmem:[%s1212_s1 + $0x30] sm:$0xff]   ;;  %v922_v10 = vld [vmem:[%s1212_s1 + $0x28] sm:$0xff]   ;;  %v155_v29 = vunpack.c.0.s8 %v154_v23 }
   0x4   :  { %v915_v3 = vld [vmem:[%s1212_s1 + $0xb8] sm:$0xff]   ;;  %824 = vmatpush3.bf16.msra.mxu0 %v914_v2  ;;  %v919_v7 = vld [vmem:[%s1212_s1 + $0xb0] sm:$0xff]   ;;  %v923_v11 = vld [vmem:[%s1212_s1 + $0xa8] sm:$0xff]  }
   0x5   :  { %846 = vmatpush3.bf16.msra.mxu1 %v915_v3  ;;  %825 = vmatprep.subr.bf16.mxu0 %v916_v4  ;;  %v924_v12 = vld [vmem:[%s1212_s1 + $0x60] sm:$0xff]   ;;  %v928_v16 = vld [vmem:[%s1212_s1 + $0x58] sm:$0xff]   ;;  %v932_v20 = vld [vmem:[%s1212_s1 + $0x50] sm:$0xff]   ;;  %v1088_v35 = vsub.s32 %v155_v29, %v157_v30 }
   0x6   :  { %847 = vmatprep.subr.bf16.mxu1 %v917_v5  ;;  %v925_v13 = vld [vmem:[%s1212_s1 + $0xe0] sm:$0xff]   ;;  %v929_v17 = vld [vmem:[%s1212_s1 + $0xd8] sm:$0xff]   ;;  %v933_v21 = vld [vmem:[%s1212_s1 + $0xd0] sm:$0xff]  }
   0x7   :  { %v926_v14 = vld [vmem:[%s1212_s1 + $0x20] sm:$0xff]   ;;  %v930_v18 = vld [vmem:[%s1212_s1 + $0x18] sm:$0xff]   ;;  %v934_v25 = vld [vmem:[%s1212_s1 + $0x10] sm:$0xff]  }
   0x8   :  { %826 = vmatpush3.bf16.msra.mxu0 %v918_v6  ;;  %v927_v15 = vld [vmem:[%s1212_s1 + $0xa0] sm:$0xff]   ;;  %v931_v19 = vld [vmem:[%s1212_s1 + $0x98] sm:$0xff]   ;;  %v935_v26 = vld [vmem:[%s1212_s1 + $0x90] sm:$0xff]  }
   0x9   :  { %848 = vmatpush3.bf16.msra.mxu1 %v919_v7  ;;  %827 = vmatprep.subr.bf16.mxu0 %v920_v8  ;;  %v936_v27 = vld [vmem:[%s1212_s1 + $0x48] sm:$0xff]   ;;  %v940_v33 = vld [vmem:[%s1212_s1 + $0x40] sm:$0xff]   ;;  %v945_v41 = vld [vmem:[%s1212_s1 + $0x178] sm:$0xff]  }
   0xa   :  { %849 = vmatprep.subr.bf16.mxu1 %v921_v9  ;;  %v937_v28 = vld [vmem:[%s1212_s1 + $0xc8] sm:$0xff]   ;;  %v941_v34 = vld [vmem:[%s1212_s1 + $0xc0] sm:$0xff]   ;;  %v946_v42 = vld [vmem:[%s1212_s1 + $0x1f8] sm:$0xff]  }
   0xb   :  { %v938_v31 = vld [vmem:[%s1212_s1 + $0x8] sm:$0xff]   ;;  %v942_v36 = vld [vmem:[%s1212_s1] sm:$0xff]   ;;  %v947_v47 = vld [vmem:[%s1212_s1 + $0x138] sm:$0xff]  }
   0xc   :  { %828 = vmatpush3.bf16.msra.mxu0 %v922_v10  ;;  %v939_v32 = vld [vmem:[%s1212_s1 + $0x88] sm:$0xff]   ;;  %v943_v37 = vld [vmem:[%s1212_s1 + $0x80] sm:$0xff]   ;;  %v949_v50 = vld [vmem:[%s1212_s1 + $0x170] sm:$0xff]  }
   0xd   :  { %850 = vmatpush3.bf16.msra.mxu1 %v923_v11  ;;  %829 = vmatprep.subr.bf16.mxu0 %v924_v12  ;;  %v15_v38 = vld [vmem:[%s1213_s0] sm:$0xff]  ;;  %v948_v52 = vld [vmem:[%s1212_s1 + $0x1b8] sm:$0xff]   ;;  %v950_v54 = vld [vmem:[%s1212_s1 + $0x1f0] sm:$0xff]  }
   0xe   :  { %851 = vmatprep.subr.bf16.mxu1 %v925_v13  ;;  %v152_v39 = vcombine.high %v15_v38, %v15_v38  ;;  %v159_v40 = vrot.slane %v15_v38, %v1088_v35  ;;  %v951_v55 = vld [vmem:[%s1212_s1 + $0x130] sm:$0xff]   ;;  %v953_v57 = vld [vmem:[%s1212_s1 + $0x168] sm:$0xff]   ;;  %v957_v61 = vld [vmem:[%s1212_s1 + $0x160] sm:$0xff]  }
   0xf   :  { %v952_v58 = vld [vmem:[%s1212_s1 + $0x1b0] sm:$0xff]   ;;  %v954_v59 = vld [vmem:[%s1212_s1 + $0x1e8] sm:$0xff]   ;;  %v958_v63 = vld [vmem:[%s1212_s1 + $0x1e0] sm:$0xff]  }
  0x10   :  { %830 = vmatpush3.bf16.msra.mxu0 %v926_v14  ;;  %v167_v43 = vcombine.high %v159_v40, %v159_v40  ;;  %v175_v44 = vrot.slane %v159_v40, %v1088_v35  ;;  %v1108_v45 = vrot.slane %v152_v39, %v1088_v35  ;;  %v955_v60 = vld [vmem:[%s1212_s1 + $0x128] sm:$0xff]   ;;  %v959_v0 = vld [vmem:[%s1212_s1 + $0x120] sm:$0xff]   ;;  %v961_v1 = vld [vmem:[%s1212_s1 + $0x158] sm:$0xff]  }
  0x11   :  { %852 = vmatpush3.bf16.msra.mxu1 %v927_v15  ;;  %831 = vmatprep.subr.bf16.mxu0 %v928_v16  ;;  %v956_v62 = vld [vmem:[%s1212_s1 + $0x1a8] sm:$0xff]   ;;  %v960_v2 = vld [vmem:[%s1212_s1 + $0x1a0] sm:$0xff]   ;;  %v962_v3 = vld [vmem:[%s1212_s1 + $0x1d8] sm:$0xff]  }
  0x12   :  { %853 = vmatprep.subr.bf16.mxu1 %v929_v17  ;;  %v189_v46 = vrot.slane %v167_v43, %v1088_v35  ;;  %v168_v48 = vcombine.high %v1108_v45, %v1108_v45  ;;  %v197_v49 = vcombine.high %v175_v44, %v175_v44  ;;  %v963_v4 = vld [vmem:[%s1212_s1 + $0x118] sm:$0xff]   ;;  %v965_v5 = vld [vmem:[%s1212_s1 + $0x150] sm:$0xff]   ;;  %v969_v9 = vld [vmem:[%s1212_s1 + $0x148] sm:$0xff]   ;;  %v182_v17 = vrot.slane %v1108_v45, %v1088_v35 }
  0x13   :  { %v964_v6 = vld [vmem:[%s1212_s1 + $0x198] sm:$0xff]   ;;  %v966_v7 = vld [vmem:[%s1212_s1 + $0x1d0] sm:$0xff]   ;;  %v970_v11 = vld [vmem:[%s1212_s1 + $0x1c8] sm:$0xff]  }
  0x14   :  { %832 = vmatpush3.bf16.msra.mxu0 %v930_v18  ;;  %625 = vmatprep.mubr.bf16.mxu0 %v189_v46  ;;  %v199_v51 = vcombine.high %v189_v46, %v189_v46  ;;  %v196_v53 = vrot.slane %v168_v48, %v1088_v35  ;;  %v967_v8 = vld [vmem:[%s1212_s1 + $0x110] sm:$0xff]   ;;  %v971_v12 = vld [vmem:[%s1212_s1 + $0x108] sm:$0xff]   ;;  %v973_v13 = vld [vmem:[%s1212_s1 + $0x140] sm:$0xff]  }
  0x15   :  { %854 = vmatpush3.bf16.msra.mxu1 %v931_v19  ;;  %833 = vmatprep.subr.bf16.mxu0 %v932_v20  ;;  %v968_v10 = vld [vmem:[%s1212_s1 + $0x190] sm:$0xff]   ;;  %v972_v14 = vld [vmem:[%s1212_s1 + $0x188] sm:$0xff]   ;;  %v974_v15 = vld [vmem:[%s1212_s1 + $0x1c0] sm:$0xff]   ;;  %v198_v19 = vcombine.high %v182_v17, %v182_v17 }
  0x16   :  { %855 = vmatprep.subr.bf16.mxu1 %v933_v21  ;;  %665 = vmatprep.mubr.bf16.mxu1 %v199_v51  ;;  %v200_v56 = vcombine.high %v196_v53, %v196_v53  ;;  %v975_v16 = vld [vmem:[%s1212_s1 + $0x100] sm:$0xff]  }
  0x17   :  { %v976_v18 = vld [vmem:[%s1212_s1 + $0x180] sm:$0xff]  }
  0x18   :  { %834 = vmatpush3.bf16.msra.mxu0 %v934_v25  ;;  %v758_v29 = vld [vmem:[%s1214_s2] ss:$0 sm:$0xff] }
  0x19   :  { %856 = vmatpush3.bf16.msra.mxu1 %v935_v26  ;;  %835 = vmatprep.subr.bf16.mxu0 %v936_v27 }
  0x1a   :  { %857 = vmatprep.subr.bf16.mxu1 %v937_v28 }
  0x1c   :  { %836 = vmatpush3.bf16.msra.mxu0 %v938_v31 }
  0x1d   :  { %858 = vmatpush3.bf16.msra.mxu1 %v939_v32  ;;  %837 = vmatprep.subr.bf16.mxu0 %v940_v33 }
  0x1e   :  { %859 = vmatprep.subr.bf16.mxu1 %v941_v34 }
  0x20   :  { %838 = vmatpush3.bf16.msra.mxu0 %v942_v36 }
  0x21   :  { %860 = vmatpush3.bf16.msra.mxu1 %v943_v37  ;;  %867 = vmatprep.subr.bf16.mxu0 %v945_v41 }
  0x22   :  { %889 = vmatprep.subr.bf16.mxu1 %v946_v42 }
  0x23   :  { %626 = vmatmul.mubr.bf16.vlgmr.msra.gmra.mxu0 %v175_v44 }
  0x24   :  { %868 = vmatpush3.bf16.msra.mxu0 %v947_v47  ;;  %666 = vmatmul.mubr.bf16.vlgmr.msra.gmra.mxu1 %v197_v49 }
  0x25   :  { %869 = vmatprep.subr.bf16.mxu0 %v949_v50  ;;  %890 = vmatpush3.bf16.msra.mxu1 %v948_v52 }
  0x26   :  { %705 = vmatprep.mubr.bf16.mxu0 %v196_v53  ;;  %891 = vmatprep.subr.bf16.mxu1 %v950_v54 }
  0x27   :  { %745 = vmatprep.mubr.bf16.mxu1 %v200_v56 }
  0x28   :  { %870 = vmatpush3.bf16.msra.mxu0 %v951_v55 }
  0x29   :  { %871 = vmatprep.subr.bf16.mxu0 %v953_v57  ;;  %892 = vmatpush3.bf16.msra.mxu1 %v952_v58 }
  0x2a   :  { %893 = vmatprep.subr.bf16.mxu1 %v954_v59 }
  0x2c   :  { %872 = vmatpush3.bf16.msra.mxu0 %v955_v60 }
  0x2d   :  { %873 = vmatprep.subr.bf16.mxu0 %v957_v61  ;;  %894 = vmatpush3.bf16.msra.mxu1 %v956_v62 }
  0x2e   :  { %895 = vmatprep.subr.bf16.mxu1 %v958_v63 }
  0x30   :  { %874 = vmatpush3.bf16.msra.mxu0 %v959_v0 }
  0x31   :  { %875 = vmatprep.subr.bf16.mxu0 %v961_v1  ;;  %896 = vmatpush3.bf16.msra.mxu1 %v960_v2 }
  0x32   :  { %897 = vmatprep.subr.bf16.mxu1 %v962_v3 }
  0x34   :  { %876 = vmatpush3.bf16.msra.mxu0 %v963_v4 }
  0x35   :  { %877 = vmatprep.subr.bf16.mxu0 %v965_v5  ;;  %898 = vmatpush3.bf16.msra.mxu1 %v964_v6 }
  0x36   :  { %899 = vmatprep.subr.bf16.mxu1 %v966_v7 }
  0x38   :  { %878 = vmatpush3.bf16.msra.mxu0 %v967_v8 }
  0x39   :  { %879 = vmatprep.subr.bf16.mxu0 %v969_v9  ;;  %900 = vmatpush3.bf16.msra.mxu1 %v968_v10 }
  0x3a   :  { %901 = vmatprep.subr.bf16.mxu1 %v970_v11 }
  0x3c   :  { %880 = vmatpush3.bf16.msra.mxu0 %v971_v12 }
  0x3d   :  { %881 = vmatprep.subr.bf16.mxu0 %v973_v13  ;;  %902 = vmatpush3.bf16.msra.mxu1 %v972_v14 }
  0x3e   :  { %903 = vmatprep.subr.bf16.mxu1 %v974_v15 }
  0x40   :  { %882 = vmatpush3.bf16.msra.mxu0 %v975_v16 }
  0x41   :  { %904 = vmatpush3.bf16.msra.mxu1 %v976_v18 }
  0x43   :  { %706 = vmatmul.mubr.bf16.vlgmr.msra.gmra.mxu0 %v182_v17 }
  0x44   :  { %746 = vmatmul.mubr.bf16.vlgmr.msra.gmra.mxu1 %v198_v19 }
  0xe3   :  { %v839_v20 = vpop.f32.mrf.mxu0 }
  0xe4   :  { %v861_v21 = vpop.f32.mrf.mxu1 }
  0xe5   :  { %v840_v22 = vpop.f32.mrf.mxu0 }
  0xe6   :  { %v862_v23 = vpop.f32.mrf.mxu1  ;;  %v841_v28 = vadd.f32 %v840_v22, %v839_v20 }
  0xe7   :  { %v842_v24 = vpop.f32.mrf.mxu0  ;;  %v863_v31 = vadd.f32 %v862_v23, %v861_v21 }
  0xe8   :  { %v864_v25 = vpop.f32.mrf.mxu1  ;;  %v628_v30 = vadd.f32 %v841_v28, %v758_v29 }
  0xe9   :  { %v843_v26 = vpop.f32.mrf.mxu0 }
  0xea   :  { %v865_v27 = vpop.f32.mrf.mxu1  ;;  %v668_v35 = vadd.f32 %v863_v31, %v628_v30 }
 0x103   :  { %v883_v32 = vpop.f32.mrf.mxu0 }
 0x104   :  { %v905_v33 = vpop.f32.mrf.mxu1 }
 0x105   :  { %v884_v34 = vpop.f32.mrf.mxu0 }
 0x106   :  { %v885_v36 = vadd.f32 %v884_v34, %v883_v32  ;;  %v906_v37 = vpop.f32.mrf.mxu1 }
 0x107   :  { %v886_v38 = vpop.f32.mrf.mxu0  ;;  %v907_v40 = vadd.f32 %v906_v37, %v905_v33 }
 0x108   :  { %v708_v39 = vadd.f32 %v885_v36, %v668_v35  ;;  %v908_v41 = vpop.f32.mrf.mxu1 }
 0x109   :  { %v887_v42 = vpop.f32.mrf.mxu0 }
 0x10a   :  { %v748_v43 = vadd.f32 %v907_v40, %v708_v39  ;;  %v909_v44 = vpop.f32.mrf.mxu1 }
 0x10c   :  { %753 = vst [vmem:[%s1215_s3] sm:$0x3] %v748_v43 }

</bundles_post_ra>
